<compile_context>
chip_gen: v7x
topology: tpu7x:2x2x1
jax: 0.10.0
libtpu: 0.0.40
codegen_flags: <defaults>
</compile_context>

<pallas_src>
import functools

import numpy as np
import jax
import jax.numpy as jnp
from jax.experimental import pallas as pl
from jax.experimental.pallas import tpu as pltpu

_BN_EPS = 1e-5
_ENC_CH = (32, 64, 128)


# ----------------------------------------------------------------------------
# Structural 0/1 matrices (exact, built once in the plan)
# ----------------------------------------------------------------------------
def _enc_select(batch, lin, lout):
    """S[j, b*lout + t, b*lin + l] = 1  iff  l == 2*t + j - 1  (Conv1d k=3, s=2, p=1)."""
    r = np.arange(batch * lout)
    c = np.arange(batch * lin)
    same_b = (r[:, None] // lout) == (c[None, :] // lin)
    rt = (r % lout)[:, None]
    cl = (c % lin)[None, :]
    return np.stack(
        [(same_b & (cl == 2 * rt + j - 1)).astype(np.float32) for j in range(3)], axis=0)


def _dec_shift(batch, lin):
    """shift[b*lin + m, b*lin + m + 1] = 1 (zero past the end of each batch item)."""
    p = np.arange(batch * lin)
    return ((p[None, :] == p[:, None] + 1) &
            ((p[:, None] % lin) != (lin - 1))).astype(np.float32)


def _dec_interleave(batch, lin):
    """P[0]: out row b*2lin + 2m <- in row b*lin + m ;  P[1]: out row b*2lin + 2m + 1."""
    lout = 2 * lin
    r = np.arange(batch * lout)
    c = np.arange(batch * lin)
    same_b = (r[:, None] // lout) == (c[None, :] // lin)
    rt = (r % lout)[:, None]
    cm = (c % lin)[None, :]
    pe = (same_b & (rt == 2 * cm)).astype(np.float32)
    po = (same_b & (rt == 2 * cm + 1)).astype(np.float32)
    return np.stack([pe, po], axis=0)


def _fc_gather(batch, enc_t):
    g = np.zeros((enc_t, batch, batch * enc_t), np.float32)
    for l in range(enc_t):
        for b in range(batch):
            g[l, b, b * enc_t + l] = 1.0
    return g, np.ascontiguousarray(np.transpose(g, (0, 2, 1)))


# ----------------------------------------------------------------------------
# The single fused kernel
# ----------------------------------------------------------------------------
def _vae_kernel(x_ref, eps_ref,
                s1_ref, w1_ref, p1_ref,
                s2_ref, w2_ref, p2_ref,
                s3_ref, w3_ref, p3_ref,
                g_ref, gt_ref, wml_ref, bml_ref, wdec_ref, bdec_ref,
                dw1_ref, dp1_ref, sh1_ref, il1_ref,
                dw2_ref, dp2_ref, sh2_ref, il2_ref,
                dw3_ref, db3_ref, sh3_ref, il3_ref,
                ml_ref, rec_ref, *, bn_eps):

    def batchnorm(y, gamma, beta):
        # BatchNorm1d, train mode: per-channel stats over rows (= batch*length),
        # biased variance, matching the PyTorch forward.
        mean = jnp.mean(y, axis=0, keepdims=True)
        d = y - mean
        var = jnp.mean(d * d, axis=0, keepdims=True)
        return d * jax.lax.rsqrt(var + bn_eps) * gamma + beta

    def enc_layer(h, s_ref, w_ref, p_ref):
        # Conv1d(k=3, s=2, p=1) + bias + ReLU + BatchNorm1d.
        #   z = h @ [W0 | W1 | W2]   (one wide MXU push, bf16 operands, f32 accumulation)
        #   y = sum_j S_j @ z_j      (S_j: exact 0/1 stride-2 tap gather, pad=1 built-in)
        cout = p_ref.shape[2]
        z = jnp.dot(h.astype(jnp.bfloat16), w_ref[...],
                    preferred_element_type=jnp.float32)
        s = s_ref[...]
        p = p_ref[...]
        y = (jnp.dot(s[0], z[:, :cout], preferred_element_type=jnp.float32)
             + jnp.dot(s[1], z[:, cout:2 * cout], preferred_element_type=jnp.float32)
             + jnp.dot(s[2], z[:, 2 * cout:], preferred_element_type=jnp.float32))
        y = jnp.maximum(y + p[0], 0.0)                      # conv bias + ReLU
        return batchnorm(y, p[1], p[2])

    def dec_layer(h, w_ref, sh_ref, il_ref, bias, gamma=None, beta=None, sigmoid=False):
        # ConvTranspose1d(k=3, s=2, p=1, op=1), polyphase:
        #   even[t] = x[t] @ W1 ;  odd[t] = x[t+1] @ W0 + x[t] @ W2
        #   t = x @ [W1 | W2 | W0]  (one wide MXU push); shift / interleave are exact 0/1.
        cout = bias.shape[-1]
        t = jnp.dot(h.astype(jnp.bfloat16), w_ref[...],
                    preferred_element_type=jnp.float32)
        even = t[:, :cout]
        odd = (jnp.dot(sh_ref[...], t[:, 2 * cout:], preferred_element_type=jnp.float32)
               + t[:, cout:2 * cout])
        il = il_ref[...]
        y = (jnp.dot(il[0], even, preferred_element_type=jnp.float32)
             + jnp.dot(il[1], odd, preferred_element_type=jnp.float32)) + bias
        if sigmoid:
            return 1.0 / (1.0 + jnp.exp(-y))                # exp on EUP, exact divide
        return batchnorm(jnp.maximum(y, 0.0), gamma, beta)

    # ---------------- encoder ----------------
    h = x_ref[...]
    h = enc_layer(h, s1_ref, w1_ref, p1_ref)
    h = enc_layer(h, s2_ref, w2_ref, p2_ref)
    h = enc_layer(h, s3_ref, w3_ref, p3_ref)                # (B*enc_t, 128)

    # ------- fc_mu | fc_logvar (merged) + reparameterize + decoder_input -------
    enc_t = wml_ref.shape[0]
    latent = eps_ref.shape[1]
    g = g_ref[...]
    gt = gt_ref[...]

    ml = None
    for l in range(enc_t):
        h_l = jnp.dot(g[l], h, preferred_element_type=jnp.float32)           # (B, 128)
        term = jnp.dot(h_l.astype(jnp.bfloat16), wml_ref[l],
                       preferred_element_type=jnp.float32)                   # (B, 2*latent)
        ml = term if ml is None else ml + term
    ml = ml + bml_ref[...]
    mu = ml[:, :latent]
    logvar = ml[:, latent:]
    z = (mu + eps_ref[...] * jnp.exp(0.5 * logvar)).astype(jnp.bfloat16)     # reparameterize

    hdec = None
    for l in range(enc_t):
        part = (jnp.dot(z, wdec_ref[l], preferred_element_type=jnp.float32)
                + bdec_ref[l])                                               # (B, 128)
        scat = jnp.dot(gt[l], part, preferred_element_type=jnp.float32)      # (B*enc_t, 128)
        hdec = scat if hdec is None else hdec + scat

    # ---------------- decoder ----------------
    pd1 = dp1_ref[...]
    pd2 = dp2_ref[...]
    h = dec_layer(hdec, dw1_ref, sh1_ref, il1_ref, pd1[0], pd1[1], pd1[2])
    h = dec_layer(h, dw2_ref, sh2_ref, il2_ref, pd2[0], pd2[1], pd2[2])
    h = dec_layer(h, dw3_ref, sh3_ref, il3_ref, db3_ref[...][0], sigmoid=True)

    ml_ref[...] = ml.astype(ml_ref.dtype)
    rec_ref[...] = h.astype(rec_ref.dtype)


# ----------------------------------------------------------------------------
# Parameters (PyTorch layouts) + one-time kernel plan
# ----------------------------------------------------------------------------
def init_params(key, input_channels, time_steps, latent_dim):
    enc_t = time_steps
    for _ in range(3):
        enc_t = (enc_t + 1) // 2
    conv_out = 128 * enc_t

    keys = jax.random.split(key, 24)
    n = lambda i, shape, s=0.05: s * jax.random.normal(keys[i], shape, jnp.float32)

    p = {}
    enc_ch = [(input_channels, _ENC_CH[0]), (_ENC_CH[0], _ENC_CH[1]), (_ENC_CH[1], _ENC_CH[2])]
    for i, (ci, co) in enumerate(enc_ch):
        p[f"enc{i}_w"] = n(i, (co, ci, 3))                  # Conv1d: (Cout, Cin, k)
        p[f"enc{i}_b"] = n(i + 3, (co,))
        p[f"enc{i}_gamma"] = jnp.ones((co,), jnp.float32)
        p[f"enc{i}_beta"] = jnp.zeros((co,), jnp.float32)
    p["fc_mu_w"] = n(6, (latent_dim, conv_out))             # Linear: (out, in)
    p["fc_mu_b"] = n(7, (latent_dim,))
    p["fc_logvar_w"] = n(8, (latent_dim, conv_out))
    p["fc_logvar_b"] = n(9, (latent_dim,))
    p["dec_in_w"] = n(10, (conv_out, latent_dim))
    p["dec_in_b"] = n(11, (conv_out,))
    dec_ch = [(_ENC_CH[2], _ENC_CH[1]), (_ENC_CH[1], _ENC_CH[0]), (_ENC_CH[0], input_channels)]
    for i, (ci, co) in enumerate(dec_ch):
        p[f"dec{i}_w"] = n(12 + i, (ci, co, 3))             # ConvTranspose1d: (Cin, Cout, k)
        p[f"dec{i}_b"] = n(15 + i, (co,))
        if i < 2:
            p[f"dec{i}_gamma"] = jnp.ones((co,), jnp.float32)
            p[f"dec{i}_beta"] = jnp.zeros((co,), jnp.float32)
    return p


def prepare_plan(params, batch, input_channels, time_steps, latent_dim):
    """One-time prep of kernel-ready operands: weight reordering, bf16 casts, and the
    exact selection / shift / interleave matrices.  Hoisted out of the per-call forward."""
    del input_channels  # implied by the weights
    lens = [time_steps]
    for _ in range(3):
        lens.append((lens[-1] + 1) // 2)
    enc_t = lens[-1]

    plan = {}
    # encoder layers: tap-gather, weights [W0|W1|W2], packed bias/gamma/beta
    for i in range(3):
        w = params[f"enc{i}_w"]                                             # (Cout, Cin, 3)
        cout = w.shape[0]
        w_all = jnp.concatenate([w[:, :, j].T for j in range(3)], axis=1)   # (Cin, 3*Cout)
        pack = jnp.stack([params[f"enc{i}_b"], params[f"enc{i}_gamma"],
                          params[f"enc{i}_beta"]], axis=0).reshape(3, 1, cout)
        plan[f"enc{i}_S"] = jnp.asarray(_enc_select(batch, lens[i], lens[i + 1]))
        plan[f"enc{i}_w"] = w_all.astype(jnp.bfloat16)
        plan[f"enc{i}_p"] = pack.astype(jnp.float32)

    # fc_mu | fc_logvar and decoder_input, reordered from torch's channel-major flatten
    cat = jnp.concatenate([params["fc_mu_w"], params["fc_logvar_w"]], axis=0)
    plan["wml"] = cat.reshape(2 * latent_dim, 128, enc_t).transpose(2, 1, 0).astype(jnp.bfloat16)
    plan["bml"] = jnp.concatenate([params["fc_mu_b"], params["fc_logvar_b"]]
                                  ).reshape(1, 2 * latent_dim).astype(jnp.float32)
    plan["wdec"] = params["dec_in_w"].reshape(128, enc_t, latent_dim
                                              ).transpose(1, 2, 0).astype(jnp.bfloat16)
    plan["bdec"] = params["dec_in_b"].reshape(128, enc_t).T.reshape(enc_t, 1, 128
                                                                    ).astype(jnp.float32)
    g, gt = _fc_gather(batch, enc_t)
    plan["G"] = jnp.asarray(g)
    plan["Gt"] = jnp.asarray(gt)

    # decoder layers: weights [W1|W2|W0], packed params, shift + interleave matrices
    dec_lens = [enc_t, 2 * enc_t, 4 * enc_t]
    for i in range(3):
        w = params[f"dec{i}_w"]                                             # (Cin, Cout, 3)
        cout = w.shape[1]
        w_all = jnp.concatenate([w[:, :, 1], w[:, :, 2], w[:, :, 0]], axis=1)
        if i < 2:
            pack = jnp.stack([params[f"dec{i}_b"], params[f"dec{i}_gamma"],
                              params[f"dec{i}_beta"]], axis=0).reshape(3, 1, cout)
        else:
            pack = params[f"dec{i}_b"].reshape(1, 1, cout)
        plan[f"dec{i}_w"] = w_all.astype(jnp.bfloat16)
        plan[f"dec{i}_p"] = pack.astype(jnp.float32)
        plan[f"dec{i}_shift"] = jnp.asarray(_dec_shift(batch, dec_lens[i]))
        plan[f"dec{i}_il"] = jnp.asarray(_dec_interleave(batch, dec_lens[i]))
    return plan


# ----------------------------------------------------------------------------
# Forward (one pallas_call)
# ----------------------------------------------------------------------------
def audio_vae_forward(plan, x, eps_key):
    B, cin, T = x.shape
    latent = plan["bml"].shape[1] // 2
    enc_t = plan["wml"].shape[0]
    t_out = 8 * enc_t

    x_cl = jnp.transpose(x, (0, 2, 1)).reshape(B * T, cin)     # channels-last rows b*T + t
    eps = jax.random.normal(eps_key, (B, latent), jnp.float32)

    operands = [x_cl, eps]
    for i in range(3):
        operands += [plan[f"enc{i}_S"], plan[f"enc{i}_w"], plan[f"enc{i}_p"]]
    operands += [plan["G"], plan["Gt"], plan["wml"], plan["bml"], plan["wdec"], plan["bdec"]]
    for i in range(3):
        operands += [plan[f"dec{i}_w"], plan[f"dec{i}_p"],
                     plan[f"dec{i}_shift"], plan[f"dec{i}_il"]]

    in_specs = [pl.BlockSpec(a.shape, lambda i, n=a.ndim: (0,) * n) for a in operands]
    out_shape = (jax.ShapeDtypeStruct((B, 2 * latent), jnp.float32),
                 jax.ShapeDtypeStruct((B * t_out, cin), jnp.float32))
    out_specs = (pl.BlockSpec((B, 2 * latent), lambda i: (0, 0)),
                 pl.BlockSpec((B * t_out, cin), lambda i: (0, 0)))

    ml, rec = pl.pallas_call(
        functools.partial(_vae_kernel, bn_eps=_BN_EPS),
        out_shape=out_shape,
        grid=(1,),
        in_specs=in_specs,
        out_specs=out_specs,
        compiler_params=pltpu.CompilerParams(dimension_semantics=("arbitrary",)),
    )(*operands)

    mu = ml[:, :latent]
    logvar = ml[:, latent:]
    recon = rec.reshape(B, t_out, cin).transpose(0, 2, 1)       # back to (B, Cin, T)
    return recon, mu, logvar


# ----------------------------------------------------------------------------
# Pure-JAX f32 reference (for a loose numerical sanity check)
# ----------------------------------------------------------------------------
def _reference_forward(params, x, eps):
    def bn(h, gamma, beta):                                     # h: (B, C, L), train stats
        mean = jnp.mean(h, axis=(0, 2), keepdims=True)
        var = jnp.mean((h - mean) ** 2, axis=(0, 2), keepdims=True)
        return (h - mean) / jnp.sqrt(var + _BN_EPS) * gamma[None, :, None] + beta[None, :, None]

    dn = ("NCH", "OIH", "NCH")
    h = x
    for i in range(3):
        h = jax.lax.conv_general_dilated(h, params[f"enc{i}_w"], window_strides=(2,),
                                         padding=((1, 1),), dimension_numbers=dn)
        h = jnp.maximum(h + params[f"enc{i}_b"][None, :, None], 0.0)
        h = bn(h, params[f"enc{i}_gamma"], params[f"enc{i}_beta"])
    B = x.shape[0]
    hf = h.reshape(B, -1)
    mu = hf @ params["fc_mu_w"].T + params["fc_mu_b"]
    logvar = hf @ params["fc_logvar_w"].T + params["fc_logvar_b"]
    z = mu + eps * jnp.exp(0.5 * logvar)
    d = (z @ params["dec_in_w"].T + params["dec_in_b"]).reshape(B, 128, h.shape[-1])
    for i in range(3):
        wf = jnp.flip(params[f"dec{i}_w"], axis=2).transpose(1, 0, 2)   # (Cout, Cin, k), flipped
        d = jax.lax.conv_general_dilated(d, wf, window_strides=(1,), padding=((1, 2),),
                                         lhs_dilation=(2,), dimension_numbers=dn)
        d = d + params[f"dec{i}_b"][None, :, None]
        if i < 2:
            d = bn(jnp.maximum(d, 0.0), params[f"dec{i}_gamma"], params[f"dec{i}_beta"])
        else:
            d = jax.nn.sigmoid(d)
    return d, mu, logvar


if __name__ == "__main__":
    # Small shapes consistent with the module (input_channels=4, time_steps=16, latent_dim=8)
    B, C_IN, T, LATENT = 2, 4, 16, 8

    root = jax.random.PRNGKey(0)
    k_params, k_x, k_eps = jax.random.split(root, 3)

    params = init_params(k_params, C_IN, T, LATENT)
    plan = prepare_plan(params, B, C_IN, T, LATENT)            # one-time kernel-ready prep
    x = jax.random.normal(k_x, (B, C_IN, T), jnp.float32)      # NCL, like PyTorch Conv1d input

    fwd = jax.jit(audio_vae_forward)
    recon, mu, logvar = fwd(plan, x, k_eps)
    jax.block_until_ready((recon, mu, logvar))

    assert recon.shape == (B, C_IN, T), recon.shape
    assert mu.shape == (B, LATENT) and logvar.shape == (B, LATENT)
    assert bool(jnp.all(jnp.isfinite(recon)))
    assert bool(jnp.all((recon >= 0.0) & (recon <= 1.0)))      # exact sigmoid output range

    # Loose sanity check vs. an f32 pure-JAX reference (kernel uses bf16 MXU operands,
    # f32 accumulation, so small divergence is expected and documented).
    eps = jax.random.normal(k_eps, (B, LATENT), jnp.float32)   # same draw as inside forward
    ref_recon, ref_mu, ref_logvar = _reference_forward(params, x, eps)
    assert float(jnp.max(jnp.abs(mu - ref_mu))) < 2e-1
    assert float(jnp.max(jnp.abs(logvar - ref_logvar))) < 2e-1
    assert float(jnp.max(jnp.abs(recon - ref_recon))) < 1e-1

    print("KERNEL_OK")
</pallas_src>

<mosaic_0001>
module attributes {stable_mosaic.version = 11 : i64} {
  func.func @_vae_kernel(%arg0: i32, %arg1: memref<32x4xf32, #tpu.memory_space<vmem>>, %arg2: memref<2x8xf32, #tpu.memory_space<vmem>>, %arg3: memref<3x16x32xf32, #tpu.memory_space<vmem>>, %arg4: memref<4x96xbf16, #tpu.memory_space<vmem>>, %arg5: memref<3x1x32xf32, #tpu.memory_space<vmem>>, %arg6: memref<3x8x16xf32, #tpu.memory_space<vmem>>, %arg7: memref<32x192xbf16, #tpu.memory_space<vmem>>, %arg8: memref<3x1x64xf32, #tpu.memory_space<vmem>>, %arg9: memref<3x4x8xf32, #tpu.memory_space<vmem>>, %arg10: memref<64x384xbf16, #tpu.memory_space<vmem>>, %arg11: memref<3x1x128xf32, #tpu.memory_space<vmem>>, %arg12: memref<2x2x4xf32, #tpu.memory_space<vmem>>, %arg13: memref<2x4x2xf32, #tpu.memory_space<vmem>>, %arg14: memref<2x128x16xbf16, #tpu.memory_space<vmem>>, %arg15: memref<1x16xf32, #tpu.memory_space<vmem>>, %arg16: memref<2x8x128xbf16, #tpu.memory_space<vmem>>, %arg17: memref<2x1x128xf32, #tpu.memory_space<vmem>>, %arg18: memref<128x192xbf16, #tpu.memory_space<vmem>>, %arg19: memref<3x1x64xf32, #tpu.memory_space<vmem>>, %arg20: memref<4x4xf32, #tpu.memory_space<vmem>>, %arg21: memref<2x8x4xf32, #tpu.memory_space<vmem>>, %arg22: memref<64x96xbf16, #tpu.memory_space<vmem>>, %arg23: memref<3x1x32xf32, #tpu.memory_space<vmem>>, %arg24: memref<8x8xf32, #tpu.memory_space<vmem>>, %arg25: memref<2x16x8xf32, #tpu.memory_space<vmem>>, %arg26: memref<32x12xbf16, #tpu.memory_space<vmem>>, %arg27: memref<1x1x4xf32, #tpu.memory_space<vmem>>, %arg28: memref<16x16xf32, #tpu.memory_space<vmem>>, %arg29: memref<2x32x16xf32, #tpu.memory_space<vmem>>, %arg30: memref<2x16xf32, #tpu.memory_space<vmem>>, %arg31: memref<32x4xf32, #tpu.memory_space<vmem>>) attributes {dimension_semantics = [#tpu.dimension_semantics<arbitrary>], iteration_bounds = array<i64: 1>, scalar_prefetch = 0 : i64, scratch_operands = 0 : i64, tpu.core_type = #tpu.core_type<tc>, window_params = [{pipeline_mode = #tpu.pipeline_mode<synchronous>, transform_indices = @transform_0, window_bounds = array<i64: 32, 4>}, {pipeline_mode = #tpu.pipeline_mode<synchronous>, transform_indices = @transform_1, window_bounds = array<i64: 2, 8>}, {pipeline_mode = #tpu.pipeline_mode<synchronous>, transform_indices = @transform_2, window_bounds = array<i64: 3, 16, 32>}, {pipeline_mode = #tpu.pipeline_mode<synchronous>, transform_indices = @transform_3, window_bounds = array<i64: 4, 96>}, {pipeline_mode = #tpu.pipeline_mode<synchronous>, transform_indices = @transform_4, window_bounds = array<i64: 3, 1, 32>}, {pipeline_mode = #tpu.pipeline_mode<synchronous>, transform_indices = @transform_5, window_bounds = array<i64: 3, 8, 16>}, {pipeline_mode = #tpu.pipeline_mode<synchronous>, transform_indices = @transform_6, window_bounds = array<i64: 32, 192>}, {pipeline_mode = #tpu.pipeline_mode<synchronous>, transform_indices = @transform_7, window_bounds = array<i64: 3, 1, 64>}, {pipeline_mode = #tpu.pipeline_mode<synchronous>, transform_indices = @transform_8, window_bounds = array<i64: 3, 4, 8>}, {pipeline_mode = #tpu.pipeline_mode<synchronous>, transform_indices = @transform_9, window_bounds = array<i64: 64, 384>}, {pipeline_mode = #tpu.pipeline_mode<synchronous>, transform_indices = @transform_10, window_bounds = array<i64: 3, 1, 128>}, {pipeline_mode = #tpu.pipeline_mode<synchronous>, transform_indices = @transform_11, window_bounds = array<i64: 2, 2, 4>}, {pipeline_mode = #tpu.pipeline_mode<synchronous>, transform_indices = @transform_12, window_bounds = array<i64: 2, 4, 2>}, {pipeline_mode = #tpu.pipeline_mode<synchronous>, transform_indices = @transform_13, window_bounds = array<i64: 2, 128, 16>}, {pipeline_mode = #tpu.pipeline_mode<synchronous>, transform_indices = @transform_14, window_bounds = array<i64: 1, 16>}, {pipeline_mode = #tpu.pipeline_mode<synchronous>, transform_indices = @transform_15, window_bounds = array<i64: 2, 8, 128>}, {pipeline_mode = #tpu.pipeline_mode<synchronous>, transform_indices = @transform_16, window_bounds = array<i64: 2, 1, 128>}, {pipeline_mode = #tpu.pipeline_mode<synchronous>, transform_indices = @transform_17, window_bounds = array<i64: 128, 192>}, {pipeline_mode = #tpu.pipeline_mode<synchronous>, transform_indices = @transform_18, window_bounds = array<i64: 3, 1, 64>}, {pipeline_mode = #tpu.pipeline_mode<synchronous>, transform_indices = @transform_19, window_bounds = array<i64: 4, 4>}, {pipeline_mode = #tpu.pipeline_mode<synchronous>, transform_indices = @transform_20, window_bounds = array<i64: 2, 8, 4>}, {pipeline_mode = #tpu.pipeline_mode<synchronous>, transform_indices = @transform_21, window_bounds = array<i64: 64, 96>}, {pipeline_mode = #tpu.pipeline_mode<synchronous>, transform_indices = @transform_22, window_bounds = array<i64: 3, 1, 32>}, {pipeline_mode = #tpu.pipeline_mode<synchronous>, transform_indices = @transform_23, window_bounds = array<i64: 8, 8>}, {pipeline_mode = #tpu.pipeline_mode<synchronous>, transform_indices = @transform_24, window_bounds = array<i64: 2, 16, 8>}, {pipeline_mode = #tpu.pipeline_mode<synchronous>, transform_indices = @transform_25, window_bounds = array<i64: 32, 12>}, {pipeline_mode = #tpu.pipeline_mode<synchronous>, transform_indices = @transform_26, window_bounds = array<i64: 1, 1, 4>}, {pipeline_mode = #tpu.pipeline_mode<synchronous>, transform_indices = @transform_27, window_bounds = array<i64: 16, 16>}, {pipeline_mode = #tpu.pipeline_mode<synchronous>, transform_indices = @transform_28, window_bounds = array<i64: 2, 32, 16>}, {pipeline_mode = #tpu.pipeline_mode<synchronous>, transform_indices = @transform_29, window_bounds = array<i64: 2, 16>}, {pipeline_mode = #tpu.pipeline_mode<synchronous>, transform_indices = @transform_30, window_bounds = array<i64: 32, 4>}]} {
    %c0 = arith.constant 0 : index
    %c0_0 = arith.constant 0 : index
    %0 = vector.load %arg1[%c0, %c0_0] : memref<32x4xf32, #tpu.memory_space<vmem>>, vector<32x4xf32>
    %1 = arith.truncf %0 : vector<32x4xf32> to vector<32x4xbf16>
    %c0_1 = arith.constant 0 : index
    %c0_2 = arith.constant 0 : index
    %2 = vector.load %arg4[%c0_1, %c0_2] : memref<4x96xbf16, #tpu.memory_space<vmem>>, vector<4x96xbf16>
    %cst = arith.constant dense<0.000000e+00> : vector<32x96xf32>
    %3 = tpu.matmul %1, %2, %cst {dimension_numbers = #tpu.dot_dimension_numbers<[1], [0], [0], [1], [0, 0, 1, 1], [], []>} : vector<32x4xbf16>, vector<4x96xbf16>, vector<32x96xf32> -> vector<32x96xf32>
    %c0_3 = arith.constant 0 : index
    %c0_4 = arith.constant 0 : index
    %c0_5 = arith.constant 0 : index
    %4 = vector.load %arg3[%c0_3, %c0_4, %c0_5] : memref<3x16x32xf32, #tpu.memory_space<vmem>>, vector<3x16x32xf32>
    %c0_6 = arith.constant 0 : index
    %c0_7 = arith.constant 0 : index
    %c0_8 = arith.constant 0 : index
    %5 = vector.load %arg5[%c0_6, %c0_7, %c0_8] : memref<3x1x32xf32, #tpu.memory_space<vmem>>, vector<3x1x32xf32>
    %6 = vector.extract_strided_slice %4 {offsets = [0, 0, 0], sizes = [1, 16, 32], strides = [1, 1, 1]} : vector<3x16x32xf32> to vector<1x16x32xf32>
    %7 = vector.shape_cast %6 : vector<1x16x32xf32> to vector<16x32xf32>
    %8 = vector.extract_strided_slice %3 {offsets = [0, 0], sizes = [32, 32], strides = [1, 1]} : vector<32x96xf32> to vector<32x32xf32>
    %cst_9 = arith.constant dense<0.000000e+00> : vector<16x32xf32>
    %9 = tpu.matmul %7, %8, %cst_9 {dimension_numbers = #tpu.dot_dimension_numbers<[1], [0], [0], [1], [0, 0, 1, 1], [], []>} : vector<16x32xf32>, vector<32x32xf32>, vector<16x32xf32> -> vector<16x32xf32>
    %10 = vector.extract_strided_slice %4 {offsets = [1, 0, 0], sizes = [1, 16, 32], strides = [1, 1, 1]} : vector<3x16x32xf32> to vector<1x16x32xf32>
    %11 = vector.shape_cast %10 : vector<1x16x32xf32> to vector<16x32xf32>
    %12 = vector.extract_strided_slice %3 {offsets = [0, 32], sizes = [32, 32], strides = [1, 1]} : vector<32x96xf32> to vector<32x32xf32>
    %cst_10 = arith.constant dense<0.000000e+00> : vector<16x32xf32>
    %13 = tpu.matmul %11, %12, %cst_10 {dimension_numbers = #tpu.dot_dimension_numbers<[1], [0], [0], [1], [0, 0, 1, 1], [], []>} : vector<16x32xf32>, vector<32x32xf32>, vector<16x32xf32> -> vector<16x32xf32>
    %14 = arith.addf %9, %13 : vector<16x32xf32>
    %15 = vector.extract_strided_slice %4 {offsets = [2, 0, 0], sizes = [1, 16, 32], strides = [1, 1, 1]} : vector<3x16x32xf32> to vector<1x16x32xf32>
    %16 = vector.shape_cast %15 : vector<1x16x32xf32> to vector<16x32xf32>
    %17 = vector.extract_strided_slice %3 {offsets = [0, 64], sizes = [32, 32], strides = [1, 1]} : vector<32x96xf32> to vector<32x32xf32>
    %cst_11 = arith.constant dense<0.000000e+00> : vector<16x32xf32>
    %18 = tpu.matmul %16, %17, %cst_11 {dimension_numbers = #tpu.dot_dimension_numbers<[1], [0], [0], [1], [0, 0, 1, 1], [], []>} : vector<16x32xf32>, vector<32x32xf32>, vector<16x32xf32> -> vector<16x32xf32>
    %19 = arith.addf %14, %18 : vector<16x32xf32>
    %20 = vector.extract_strided_slice %5 {offsets = [0, 0, 0], sizes = [1, 1, 32], strides = [1, 1, 1]} : vector<3x1x32xf32> to vector<1x1x32xf32>
    %21 = vector.shape_cast %20 : vector<1x1x32xf32> to vector<1x32xf32>
    %22 = vector.broadcast %21 : vector<1x32xf32> to vector<16x32xf32>
    %23 = arith.addf %19, %22 : vector<16x32xf32>
    %cst_12 = arith.constant 0.000000e+00 : f32
    %24 = vector.broadcast %cst_12 : f32 to vector<16x32xf32>
    %25 = arith.maximumf %23, %24 : vector<16x32xf32>
    %26 = vector.extract_strided_slice %5 {offsets = [1, 0, 0], sizes = [1, 1, 32], strides = [1, 1, 1]} : vector<3x1x32xf32> to vector<1x1x32xf32>
    %27 = vector.shape_cast %26 : vector<1x1x32xf32> to vector<1x32xf32>
    %28 = vector.extract_strided_slice %5 {offsets = [2, 0, 0], sizes = [1, 1, 32], strides = [1, 1, 1]} : vector<3x1x32xf32> to vector<1x1x32xf32>
    %29 = vector.shape_cast %28 : vector<1x1x32xf32> to vector<1x32xf32>
    %cst_13 = arith.constant dense<0.000000e+00> : vector<32xf32>
    %30 = vector.multi_reduction <add>, %25, %cst_13 [0] : vector<16x32xf32> to vector<32xf32>
    %31 = vector.shape_cast %30 : vector<32xf32> to vector<1x32xf32>
    %cst_14 = arith.constant 1.600000e+01 : f32
    %32 = vector.broadcast %cst_14 : f32 to vector<1x32xf32>
    %33 = arith.divf %31, %32 : vector<1x32xf32>
    %34 = vector.broadcast %33 : vector<1x32xf32> to vector<16x32xf32>
    %35 = arith.subf %25, %34 : vector<16x32xf32>
    %36 = arith.mulf %35, %35 : vector<16x32xf32>
    %cst_15 = arith.constant dense<0.000000e+00> : vector<32xf32>
    %37 = vector.multi_reduction <add>, %36, %cst_15 [0] : vector<16x32xf32> to vector<32xf32>
    %38 = vector.shape_cast %37 : vector<32xf32> to vector<1x32xf32>
    %cst_16 = arith.constant 1.600000e+01 : f32
    %39 = vector.broadcast %cst_16 : f32 to vector<1x32xf32>
    %40 = arith.divf %38, %39 : vector<1x32xf32>
    %cst_17 = arith.constant 9.99999974E-6 : f32
    %41 = vector.broadcast %cst_17 : f32 to vector<1x32xf32>
    %42 = arith.addf %40, %41 : vector<1x32xf32>
    %43 = math.rsqrt %42 : vector<1x32xf32>
    %44 = vector.broadcast %43 : vector<1x32xf32> to vector<16x32xf32>
    %45 = arith.mulf %35, %44 : vector<16x32xf32>
    %46 = vector.broadcast %27 : vector<1x32xf32> to vector<16x32xf32>
    %47 = arith.mulf %45, %46 : vector<16x32xf32>
    %48 = vector.broadcast %29 : vector<1x32xf32> to vector<16x32xf32>
    %49 = arith.addf %47, %48 : vector<16x32xf32>
    %50 = arith.truncf %49 : vector<16x32xf32> to vector<16x32xbf16>
    %c0_18 = arith.constant 0 : index
    %c0_19 = arith.constant 0 : index
    %51 = vector.load %arg7[%c0_18, %c0_19] : memref<32x192xbf16, #tpu.memory_space<vmem>>, vector<32x192xbf16>
    %cst_20 = arith.constant dense<0.000000e+00> : vector<16x192xf32>
    %52 = tpu.matmul %50, %51, %cst_20 {dimension_numbers = #tpu.dot_dimension_numbers<[1], [0], [0], [1], [0, 0, 1, 1], [], []>} : vector<16x32xbf16>, vector<32x192xbf16>, vector<16x192xf32> -> vector<16x192xf32>
    %c0_21 = arith.constant 0 : index
    %c0_22 = arith.constant 0 : index
    %c0_23 = arith.constant 0 : index
    %53 = vector.load %arg6[%c0_21, %c0_22, %c0_23] : memref<3x8x16xf32, #tpu.memory_space<vmem>>, vector<3x8x16xf32>
    %c0_24 = arith.constant 0 : index
    %c0_25 = arith.constant 0 : index
    %c0_26 = arith.constant 0 : index
    %54 = vector.load %arg8[%c0_24, %c0_25, %c0_26] : memref<3x1x64xf32, #tpu.memory_space<vmem>>, vector<3x1x64xf32>
    %55 = vector.extract_strided_slice %53 {offsets = [0, 0, 0], sizes = [1, 8, 16], strides = [1, 1, 1]} : vector<3x8x16xf32> to vector<1x8x16xf32>
    %56 = vector.shape_cast %55 : vector<1x8x16xf32> to vector<8x16xf32>
    %57 = vector.extract_strided_slice %52 {offsets = [0, 0], sizes = [16, 64], strides = [1, 1]} : vector<16x192xf32> to vector<16x64xf32>
    %cst_27 = arith.constant dense<0.000000e+00> : vector<8x64xf32>
    %58 = tpu.matmul %56, %57, %cst_27 {dimension_numbers = #tpu.dot_dimension_numbers<[1], [0], [0], [1], [0, 0, 1, 1], [], []>} : vector<8x16xf32>, vector<16x64xf32>, vector<8x64xf32> -> vector<8x64xf32>
    %59 = vector.extract_strided_slice %53 {offsets = [1, 0, 0], sizes = [1, 8, 16], strides = [1, 1, 1]} : vector<3x8x16xf32> to vector<1x8x16xf32>
    %60 = vector.shape_cast %59 : vector<1x8x16xf32> to vector<8x16xf32>
    %61 = vector.extract_strided_slice %52 {offsets = [0, 64], sizes = [16, 64], strides = [1, 1]} : vector<16x192xf32> to vector<16x64xf32>
    %cst_28 = arith.constant dense<0.000000e+00> : vector<8x64xf32>
    %62 = tpu.matmul %60, %61, %cst_28 {dimension_numbers = #tpu.dot_dimension_numbers<[1], [0], [0], [1], [0, 0, 1, 1], [], []>} : vector<8x16xf32>, vector<16x64xf32>, vector<8x64xf32> -> vector<8x64xf32>
    %63 = arith.addf %58, %62 : vector<8x64xf32>
    %64 = vector.extract_strided_slice %53 {offsets = [2, 0, 0], sizes = [1, 8, 16], strides = [1, 1, 1]} : vector<3x8x16xf32> to vector<1x8x16xf32>
    %65 = vector.shape_cast %64 : vector<1x8x16xf32> to vector<8x16xf32>
    %66 = vector.extract_strided_slice %52 {offsets = [0, 128], sizes = [16, 64], strides = [1, 1]} : vector<16x192xf32> to vector<16x64xf32>
    %cst_29 = arith.constant dense<0.000000e+00> : vector<8x64xf32>
    %67 = tpu.matmul %65, %66, %cst_29 {dimension_numbers = #tpu.dot_dimension_numbers<[1], [0], [0], [1], [0, 0, 1, 1], [], []>} : vector<8x16xf32>, vector<16x64xf32>, vector<8x64xf32> -> vector<8x64xf32>
    %68 = arith.addf %63, %67 : vector<8x64xf32>
    %69 = vector.extract_strided_slice %54 {offsets = [0, 0, 0], sizes = [1, 1, 64], strides = [1, 1, 1]} : vector<3x1x64xf32> to vector<1x1x64xf32>
    %70 = vector.shape_cast %69 : vector<1x1x64xf32> to vector<1x64xf32>
    %71 = vector.broadcast %70 : vector<1x64xf32> to vector<8x64xf32>
    %72 = arith.addf %68, %71 : vector<8x64xf32>
    %cst_30 = arith.constant 0.000000e+00 : f32
    %73 = vector.broadcast %cst_30 : f32 to vector<8x64xf32>
    %74 = arith.maximumf %72, %73 : vector<8x64xf32>
    %75 = vector.extract_strided_slice %54 {offsets = [1, 0, 0], sizes = [1, 1, 64], strides = [1, 1, 1]} : vector<3x1x64xf32> to vector<1x1x64xf32>
    %76 = vector.shape_cast %75 : vector<1x1x64xf32> to vector<1x64xf32>
    %77 = vector.extract_strided_slice %54 {offsets = [2, 0, 0], sizes = [1, 1, 64], strides = [1, 1, 1]} : vector<3x1x64xf32> to vector<1x1x64xf32>
    %78 = vector.shape_cast %77 : vector<1x1x64xf32> to vector<1x64xf32>
    %cst_31 = arith.constant dense<0.000000e+00> : vector<64xf32>
    %79 = vector.multi_reduction <add>, %74, %cst_31 [0] : vector<8x64xf32> to vector<64xf32>
    %80 = vector.shape_cast %79 : vector<64xf32> to vector<1x64xf32>
    %cst_32 = arith.constant 8.000000e+00 : f32
    %81 = vector.broadcast %cst_32 : f32 to vector<1x64xf32>
    %82 = arith.divf %80, %81 : vector<1x64xf32>
    %83 = vector.broadcast %82 : vector<1x64xf32> to vector<8x64xf32>
    %84 = arith.subf %74, %83 : vector<8x64xf32>
    %85 = arith.mulf %84, %84 : vector<8x64xf32>
    %cst_33 = arith.constant dense<0.000000e+00> : vector<64xf32>
    %86 = vector.multi_reduction <add>, %85, %cst_33 [0] : vector<8x64xf32> to vector<64xf32>
    %87 = vector.shape_cast %86 : vector<64xf32> to vector<1x64xf32>
    %cst_34 = arith.constant 8.000000e+00 : f32
    %88 = vector.broadcast %cst_34 : f32 to vector<1x64xf32>
    %89 = arith.divf %87, %88 : vector<1x64xf32>
    %cst_35 = arith.constant 9.99999974E-6 : f32
    %90 = vector.broadcast %cst_35 : f32 to vector<1x64xf32>
    %91 = arith.addf %89, %90 : vector<1x64xf32>
    %92 = math.rsqrt %91 : vector<1x64xf32>
    %93 = vector.broadcast %92 : vector<1x64xf32> to vector<8x64xf32>
    %94 = arith.mulf %84, %93 : vector<8x64xf32>
    %95 = vector.broadcast %76 : vector<1x64xf32> to vector<8x64xf32>
    %96 = arith.mulf %94, %95 : vector<8x64xf32>
    %97 = vector.broadcast %78 : vector<1x64xf32> to vector<8x64xf32>
    %98 = arith.addf %96, %97 : vector<8x64xf32>
    %99 = arith.truncf %98 : vector<8x64xf32> to vector<8x64xbf16>
    %c0_36 = arith.constant 0 : index
    %c0_37 = arith.constant 0 : index
    %100 = vector.load %arg10[%c0_36, %c0_37] : memref<64x384xbf16, #tpu.memory_space<vmem>>, vector<64x384xbf16>
    %cst_38 = arith.constant dense<0.000000e+00> : vector<8x384xf32>
    %101 = tpu.matmul %99, %100, %cst_38 {dimension_numbers = #tpu.dot_dimension_numbers<[1], [0], [0], [1], [0, 0, 1, 1], [], []>} : vector<8x64xbf16>, vector<64x384xbf16>, vector<8x384xf32> -> vector<8x384xf32>
    %c0_39 = arith.constant 0 : index
    %c0_40 = arith.constant 0 : index
    %c0_41 = arith.constant 0 : index
    %102 = vector.load %arg9[%c0_39, %c0_40, %c0_41] : memref<3x4x8xf32, #tpu.memory_space<vmem>>, vector<3x4x8xf32>
    %c0_42 = arith.constant 0 : index
    %c0_43 = arith.constant 0 : index
    %c0_44 = arith.constant 0 : index
    %103 = vector.load %arg11[%c0_42, %c0_43, %c0_44] : memref<3x1x128xf32, #tpu.memory_space<vmem>>, vector<3x1x128xf32>
    %104 = vector.extract_strided_slice %102 {offsets = [0, 0, 0], sizes = [1, 4, 8], strides = [1, 1, 1]} : vector<3x4x8xf32> to vector<1x4x8xf32>
    %105 = vector.shape_cast %104 : vector<1x4x8xf32> to vector<4x8xf32>
    %106 = vector.extract_strided_slice %101 {offsets = [0, 0], sizes = [8, 128], strides = [1, 1]} : vector<8x384xf32> to vector<8x128xf32>
    %cst_45 = arith.constant dense<0.000000e+00> : vector<4x128xf32>
    %107 = tpu.matmul %105, %106, %cst_45 {dimension_numbers = #tpu.dot_dimension_numbers<[1], [0], [0], [1], [0, 0, 1, 1], [], []>} : vector<4x8xf32>, vector<8x128xf32>, vector<4x128xf32> -> vector<4x128xf32>
    %108 = vector.extract_strided_slice %102 {offsets = [1, 0, 0], sizes = [1, 4, 8], strides = [1, 1, 1]} : vector<3x4x8xf32> to vector<1x4x8xf32>
    %109 = vector.shape_cast %108 : vector<1x4x8xf32> to vector<4x8xf32>
    %110 = vector.extract_strided_slice %101 {offsets = [0, 128], sizes = [8, 128], strides = [1, 1]} : vector<8x384xf32> to vector<8x128xf32>
    %cst_46 = arith.constant dense<0.000000e+00> : vector<4x128xf32>
    %111 = tpu.matmul %109, %110, %cst_46 {dimension_numbers = #tpu.dot_dimension_numbers<[1], [0], [0], [1], [0, 0, 1, 1], [], []>} : vector<4x8xf32>, vector<8x128xf32>, vector<4x128xf32> -> vector<4x128xf32>
    %112 = arith.addf %107, %111 : vector<4x128xf32>
    %113 = vector.extract_strided_slice %102 {offsets = [2, 0, 0], sizes = [1, 4, 8], strides = [1, 1, 1]} : vector<3x4x8xf32> to vector<1x4x8xf32>
    %114 = vector.shape_cast %113 : vector<1x4x8xf32> to vector<4x8xf32>
    %115 = vector.extract_strided_slice %101 {offsets = [0, 256], sizes = [8, 128], strides = [1, 1]} : vector<8x384xf32> to vector<8x128xf32>
    %cst_47 = arith.constant dense<0.000000e+00> : vector<4x128xf32>
    %116 = tpu.matmul %114, %115, %cst_47 {dimension_numbers = #tpu.dot_dimension_numbers<[1], [0], [0], [1], [0, 0, 1, 1], [], []>} : vector<4x8xf32>, vector<8x128xf32>, vector<4x128xf32> -> vector<4x128xf32>
    %117 = arith.addf %112, %116 : vector<4x128xf32>
    %118 = vector.extract_strided_slice %103 {offsets = [0, 0, 0], sizes = [1, 1, 128], strides = [1, 1, 1]} : vector<3x1x128xf32> to vector<1x1x128xf32>
    %119 = vector.shape_cast %118 : vector<1x1x128xf32> to vector<1x128xf32>
    %120 = vector.broadcast %119 : vector<1x128xf32> to vector<4x128xf32>
    %121 = arith.addf %117, %120 : vector<4x128xf32>
    %cst_48 = arith.constant 0.000000e+00 : f32
    %122 = vector.broadcast %cst_48 : f32 to vector<4x128xf32>
    %123 = arith.maximumf %121, %122 : vector<4x128xf32>
    %124 = vector.extract_strided_slice %103 {offsets = [1, 0, 0], sizes = [1, 1, 128], strides = [1, 1, 1]} : vector<3x1x128xf32> to vector<1x1x128xf32>
    %125 = vector.shape_cast %124 : vector<1x1x128xf32> to vector<1x128xf32>
    %126 = vector.extract_strided_slice %103 {offsets = [2, 0, 0], sizes = [1, 1, 128], strides = [1, 1, 1]} : vector<3x1x128xf32> to vector<1x1x128xf32>
    %127 = vector.shape_cast %126 : vector<1x1x128xf32> to vector<1x128xf32>
    %cst_49 = arith.constant dense<0.000000e+00> : vector<128xf32>
    %128 = vector.multi_reduction <add>, %123, %cst_49 [0] : vector<4x128xf32> to vector<128xf32>
    %129 = vector.shape_cast %128 : vector<128xf32> to vector<1x128xf32>
    %cst_50 = arith.constant 4.000000e+00 : f32
    %130 = vector.broadcast %cst_50 : f32 to vector<1x128xf32>
    %131 = arith.divf %129, %130 : vector<1x128xf32>
    %132 = vector.broadcast %131 : vector<1x128xf32> to vector<4x128xf32>
    %133 = arith.subf %123, %132 : vector<4x128xf32>
    %134 = arith.mulf %133, %133 : vector<4x128xf32>
    %cst_51 = arith.constant dense<0.000000e+00> : vector<128xf32>
    %135 = vector.multi_reduction <add>, %134, %cst_51 [0] : vector<4x128xf32> to vector<128xf32>
    %136 = vector.shape_cast %135 : vector<128xf32> to vector<1x128xf32>
    %cst_52 = arith.constant 4.000000e+00 : f32
    %137 = vector.broadcast %cst_52 : f32 to vector<1x128xf32>
    %138 = arith.divf %136, %137 : vector<1x128xf32>
    %cst_53 = arith.constant 9.99999974E-6 : f32
    %139 = vector.broadcast %cst_53 : f32 to vector<1x128xf32>
    %140 = arith.addf %138, %139 : vector<1x128xf32>
    %141 = math.rsqrt %140 : vector<1x128xf32>
    %142 = vector.broadcast %141 : vector<1x128xf32> to vector<4x128xf32>
    %143 = arith.mulf %133, %142 : vector<4x128xf32>
    %144 = vector.broadcast %125 : vector<1x128xf32> to vector<4x128xf32>
    %145 = arith.mulf %143, %144 : vector<4x128xf32>
    %146 = vector.broadcast %127 : vector<1x128xf32> to vector<4x128xf32>
    %147 = arith.addf %145, %146 : vector<4x128xf32>
    %c0_54 = arith.constant 0 : index
    %c0_55 = arith.constant 0 : index
    %c0_56 = arith.constant 0 : index
    %148 = vector.load %arg12[%c0_54, %c0_55, %c0_56] : memref<2x2x4xf32, #tpu.memory_space<vmem>>, vector<2x2x4xf32>
    %c0_57 = arith.constant 0 : index
    %c0_58 = arith.constant 0 : index
    %c0_59 = arith.constant 0 : index
    %149 = vector.load %arg13[%c0_57, %c0_58, %c0_59] : memref<2x4x2xf32, #tpu.memory_space<vmem>>, vector<2x4x2xf32>
    %150 = vector.extract_strided_slice %148 {offsets = [0, 0, 0], sizes = [1, 2, 4], strides = [1, 1, 1]} : vector<2x2x4xf32> to vector<1x2x4xf32>
    %151 = vector.shape_cast %150 : vector<1x2x4xf32> to vector<2x4xf32>
    %cst_60 = arith.constant dense<0.000000e+00> : vector<2x128xf32>
    %152 = tpu.matmul %151, %147, %cst_60 {dimension_numbers = #tpu.dot_dimension_numbers<[1], [0], [0], [1], [0, 0, 1, 1], [], []>} : vector<2x4xf32>, vector<4x128xf32>, vector<2x128xf32> -> vector<2x128xf32>
    %153 = arith.truncf %152 : vector<2x128xf32> to vector<2x128xbf16>
    %c0_61 = arith.constant 0 : index
    %c0_62 = arith.constant 0 : index
    %c0_63 = arith.constant 0 : index
    %154 = vector.load %arg14[%c0_61, %c0_62, %c0_63] : memref<2x128x16xbf16, #tpu.memory_space<vmem>>, vector<1x128x16xbf16>
    %155 = vector.shape_cast %154 : vector<1x128x16xbf16> to vector<128x16xbf16>
    %cst_64 = arith.constant dense<0.000000e+00> : vector<2x16xf32>
    %156 = tpu.matmul %153, %155, %cst_64 {dimension_numbers = #tpu.dot_dimension_numbers<[1], [0], [0], [1], [0, 0, 1, 1], [], []>} : vector<2x128xbf16>, vector<128x16xbf16>, vector<2x16xf32> -> vector<2x16xf32>
    %157 = vector.extract_strided_slice %148 {offsets = [1, 0, 0], sizes = [1, 2, 4], strides = [1, 1, 1]} : vector<2x2x4xf32> to vector<1x2x4xf32>
    %158 = vector.shape_cast %157 : vector<1x2x4xf32> to vector<2x4xf32>
    %cst_65 = arith.constant dense<0.000000e+00> : vector<2x128xf32>
    %159 = tpu.matmul %158, %147, %cst_65 {dimension_numbers = #tpu.dot_dimension_numbers<[1], [0], [0], [1], [0, 0, 1, 1], [], []>} : vector<2x4xf32>, vector<4x128xf32>, vector<2x128xf32> -> vector<2x128xf32>
    %160 = arith.truncf %159 : vector<2x128xf32> to vector<2x128xbf16>
    %c1 = arith.constant 1 : index
    %c0_66 = arith.constant 0 : index
    %c0_67 = arith.constant 0 : index
    %161 = vector.load %arg14[%c1, %c0_66, %c0_67] : memref<2x128x16xbf16, #tpu.memory_space<vmem>>, vector<1x128x16xbf16>
    %162 = vector.shape_cast %161 : vector<1x128x16xbf16> to vector<128x16xbf16>
    %cst_68 = arith.constant dense<0.000000e+00> : vector<2x16xf32>
    %163 = tpu.matmul %160, %162, %cst_68 {dimension_numbers = #tpu.dot_dimension_numbers<[1], [0], [0], [1], [0, 0, 1, 1], [], []>} : vector<2x128xbf16>, vector<128x16xbf16>, vector<2x16xf32> -> vector<2x16xf32>
    %164 = arith.addf %156, %163 : vector<2x16xf32>
    %c0_69 = arith.constant 0 : index
    %c0_70 = arith.constant 0 : index
    %165 = vector.load %arg15[%c0_69, %c0_70] : memref<1x16xf32, #tpu.memory_space<vmem>>, vector<1x16xf32>
    %166 = vector.broadcast %165 : vector<1x16xf32> to vector<2x16xf32>
    %167 = arith.addf %164, %166 : vector<2x16xf32>
    %168 = vector.extract_strided_slice %167 {offsets = [0, 0], sizes = [2, 8], strides = [1, 1]} : vector<2x16xf32> to vector<2x8xf32>
    %169 = vector.extract_strided_slice %167 {offsets = [0, 8], sizes = [2, 8], strides = [1, 1]} : vector<2x16xf32> to vector<2x8xf32>
    %c0_71 = arith.constant 0 : index
    %c0_72 = arith.constant 0 : index
    %170 = vector.load %arg2[%c0_71, %c0_72] : memref<2x8xf32, #tpu.memory_space<vmem>>, vector<2x8xf32>
    %cst_73 = arith.constant 5.000000e-01 : f32
    %171 = vector.broadcast %cst_73 : f32 to vector<2x8xf32>
    %172 = arith.mulf %171, %169 : vector<2x8xf32>
    %173 = math.exp %172 : vector<2x8xf32>
    %174 = arith.mulf %170, %173 : vector<2x8xf32>
    %175 = arith.addf %168, %174 : vector<2x8xf32>
    %176 = arith.truncf %175 : vector<2x8xf32> to vector<2x8xbf16>
    %c0_74 = arith.constant 0 : index
    %c0_75 = arith.constant 0 : index
    %c0_76 = arith.constant 0 : index
    %177 = vector.load %arg16[%c0_74, %c0_75, %c0_76] : memref<2x8x128xbf16, #tpu.memory_space<vmem>>, vector<1x8x128xbf16>
    %178 = vector.shape_cast %177 : vector<1x8x128xbf16> to vector<8x128xbf16>
    %cst_77 = arith.constant dense<0.000000e+00> : vector<2x128xf32>
    %179 = tpu.matmul %176, %178, %cst_77 {dimension_numbers = #tpu.dot_dimension_numbers<[1], [0], [0], [1], [0, 0, 1, 1], [], []>} : vector<2x8xbf16>, vector<8x128xbf16>, vector<2x128xf32> -> vector<2x128xf32>
    %c0_78 = arith.constant 0 : index
    %c0_79 = arith.constant 0 : index
    %c0_80 = arith.constant 0 : index
    %180 = vector.load %arg17[%c0_78, %c0_79, %c0_80] : memref<2x1x128xf32, #tpu.memory_space<vmem>>, vector<1x1x128xf32>
    %181 = vector.shape_cast %180 : vector<1x1x128xf32> to vector<1x128xf32>
    %182 = vector.broadcast %181 : vector<1x128xf32> to vector<2x128xf32>
    %183 = arith.addf %179, %182 : vector<2x128xf32>
    %184 = vector.extract_strided_slice %149 {offsets = [0, 0, 0], sizes = [1, 4, 2], strides = [1, 1, 1]} : vector<2x4x2xf32> to vector<1x4x2xf32>
    %185 = vector.shape_cast %184 : vector<1x4x2xf32> to vector<4x2xf32>
    %cst_81 = arith.constant dense<0.000000e+00> : vector<4x128xf32>
    %186 = tpu.matmul %185, %183, %cst_81 {dimension_numbers = #tpu.dot_dimension_numbers<[1], [0], [0], [1], [0, 0, 1, 1], [], []>} : vector<4x2xf32>, vector<2x128xf32>, vector<4x128xf32> -> vector<4x128xf32>
    %c1_82 = arith.constant 1 : index
    %c0_83 = arith.constant 0 : index
    %c0_84 = arith.constant 0 : index
    %187 = vector.load %arg16[%c1_82, %c0_83, %c0_84] : memref<2x8x128xbf16, #tpu.memory_space<vmem>>, vector<1x8x128xbf16>
    %188 = vector.shape_cast %187 : vector<1x8x128xbf16> to vector<8x128xbf16>
    %cst_85 = arith.constant dense<0.000000e+00> : vector<2x128xf32>
    %189 = tpu.matmul %176, %188, %cst_85 {dimension_numbers = #tpu.dot_dimension_numbers<[1], [0], [0], [1], [0, 0, 1, 1], [], []>} : vector<2x8xbf16>, vector<8x128xbf16>, vector<2x128xf32> -> vector<2x128xf32>
    %c1_86 = arith.constant 1 : index
    %c0_87 = arith.constant 0 : index
    %c0_88 = arith.constant 0 : index
    %190 = vector.load %arg17[%c1_86, %c0_87, %c0_88] : memref<2x1x128xf32, #tpu.memory_space<vmem>>, vector<1x1x128xf32>
    %191 = vector.shape_cast %190 : vector<1x1x128xf32> to vector<1x128xf32>
    %192 = vector.broadcast %191 : vector<1x128xf32> to vector<2x128xf32>
    %193 = arith.addf %189, %192 : vector<2x128xf32>
    %194 = vector.extract_strided_slice %149 {offsets = [1, 0, 0], sizes = [1, 4, 2], strides = [1, 1, 1]} : vector<2x4x2xf32> to vector<1x4x2xf32>
    %195 = vector.shape_cast %194 : vector<1x4x2xf32> to vector<4x2xf32>
    %cst_89 = arith.constant dense<0.000000e+00> : vector<4x128xf32>
    %196 = tpu.matmul %195, %193, %cst_89 {dimension_numbers = #tpu.dot_dimension_numbers<[1], [0], [0], [1], [0, 0, 1, 1], [], []>} : vector<4x2xf32>, vector<2x128xf32>, vector<4x128xf32> -> vector<4x128xf32>
    %197 = arith.addf %186, %196 : vector<4x128xf32>
    %c0_90 = arith.constant 0 : index
    %c0_91 = arith.constant 0 : index
    %c0_92 = arith.constant 0 : index
    %198 = vector.load %arg19[%c0_90, %c0_91, %c0_92] : memref<3x1x64xf32, #tpu.memory_space<vmem>>, vector<3x1x64xf32>
    %c0_93 = arith.constant 0 : index
    %c0_94 = arith.constant 0 : index
    %c0_95 = arith.constant 0 : index
    %199 = vector.load %arg23[%c0_93, %c0_94, %c0_95] : memref<3x1x32xf32, #tpu.memory_space<vmem>>, vector<3x1x32xf32>
    %200 = vector.extract_strided_slice %198 {offsets = [0, 0, 0], sizes = [1, 1, 64], strides = [1, 1, 1]} : vector<3x1x64xf32> to vector<1x1x64xf32>
    %201 = vector.shape_cast %200 : vector<1x1x64xf32> to vector<1x64xf32>
    %202 = vector.extract_strided_slice %198 {offsets = [1, 0, 0], sizes = [1, 1, 64], strides = [1, 1, 1]} : vector<3x1x64xf32> to vector<1x1x64xf32>
    %203 = vector.shape_cast %202 : vector<1x1x64xf32> to vector<1x64xf32>
    %204 = vector.extract_strided_slice %198 {offsets = [2, 0, 0], sizes = [1, 1, 64], strides = [1, 1, 1]} : vector<3x1x64xf32> to vector<1x1x64xf32>
    %205 = vector.shape_cast %204 : vector<1x1x64xf32> to vector<1x64xf32>
    %206 = arith.truncf %197 : vector<4x128xf32> to vector<4x128xbf16>
    %c0_96 = arith.constant 0 : index
    %c0_97 = arith.constant 0 : index
    %207 = vector.load %arg18[%c0_96, %c0_97] : memref<128x192xbf16, #tpu.memory_space<vmem>>, vector<128x192xbf16>
    %cst_98 = arith.constant dense<0.000000e+00> : vector<4x192xf32>
    %208 = tpu.matmul %206, %207, %cst_98 {dimension_numbers = #tpu.dot_dimension_numbers<[1], [0], [0], [1], [0, 0, 1, 1], [], []>} : vector<4x128xbf16>, vector<128x192xbf16>, vector<4x192xf32> -> vector<4x192xf32>
    %209 = vector.extract_strided_slice %208 {offsets = [0, 0], sizes = [4, 64], strides = [1, 1]} : vector<4x192xf32> to vector<4x64xf32>
    %c0_99 = arith.constant 0 : index
    %c0_100 = arith.constant 0 : index
    %210 = vector.load %arg20[%c0_99, %c0_100] : memref<4x4xf32, #tpu.memory_space<vmem>>, vector<4x4xf32>
    %211 = vector.extract_strided_slice %208 {offsets = [0, 128], sizes = [4, 64], strides = [1, 1]} : vector<4x192xf32> to vector<4x64xf32>
    %cst_101 = arith.constant dense<0.000000e+00> : vector<4x64xf32>
    %212 = tpu.matmul %210, %211, %cst_101 {dimension_numbers = #tpu.dot_dimension_numbers<[1], [0], [0], [1], [0, 0, 1, 1], [], []>} : vector<4x4xf32>, vector<4x64xf32>, vector<4x64xf32> -> vector<4x64xf32>
    %213 = vector.extract_strided_slice %208 {offsets = [0, 64], sizes = [4, 64], strides = [1, 1]} : vector<4x192xf32> to vector<4x64xf32>
    %214 = arith.addf %212, %213 : vector<4x64xf32>
    %c0_102 = arith.constant 0 : index
    %c0_103 = arith.constant 0 : index
    %c0_104 = arith.constant 0 : index
    %215 = vector.load %arg21[%c0_102, %c0_103, %c0_104] : memref<2x8x4xf32, #tpu.memory_space<vmem>>, vector<2x8x4xf32>
    %216 = vector.extract_strided_slice %215 {offsets = [0, 0, 0], sizes = [1, 8, 4], strides = [1, 1, 1]} : vector<2x8x4xf32> to vector<1x8x4xf32>
    %217 = vector.shape_cast %216 : vector<1x8x4xf32> to vector<8x4xf32>
    %cst_105 = arith.constant dense<0.000000e+00> : vector<8x64xf32>
    %218 = tpu.matmul %217, %209, %cst_105 {dimension_numbers = #tpu.dot_dimension_numbers<[1], [0], [0], [1], [0, 0, 1, 1], [], []>} : vector<8x4xf32>, vector<4x64xf32>, vector<8x64xf32> -> vector<8x64xf32>
    %219 = vector.extract_strided_slice %215 {offsets = [1, 0, 0], sizes = [1, 8, 4], strides = [1, 1, 1]} : vector<2x8x4xf32> to vector<1x8x4xf32>
    %220 = vector.shape_cast %219 : vector<1x8x4xf32> to vector<8x4xf32>
    %cst_106 = arith.constant dense<0.000000e+00> : vector<8x64xf32>
    %221 = tpu.matmul %220, %214, %cst_106 {dimension_numbers = #tpu.dot_dimension_numbers<[1], [0], [0], [1], [0, 0, 1, 1], [], []>} : vector<8x4xf32>, vector<4x64xf32>, vector<8x64xf32> -> vector<8x64xf32>
    %222 = arith.addf %218, %221 : vector<8x64xf32>
    %223 = vector.broadcast %201 : vector<1x64xf32> to vector<8x64xf32>
    %224 = arith.addf %222, %223 : vector<8x64xf32>
    %cst_107 = arith.constant 0.000000e+00 : f32
    %225 = vector.broadcast %cst_107 : f32 to vector<8x64xf32>
    %226 = arith.maximumf %224, %225 : vector<8x64xf32>
    %cst_108 = arith.constant dense<0.000000e+00> : vector<64xf32>
    %227 = vector.multi_reduction <add>, %226, %cst_108 [0] : vector<8x64xf32> to vector<64xf32>
    %228 = vector.shape_cast %227 : vector<64xf32> to vector<1x64xf32>
    %cst_109 = arith.constant 8.000000e+00 : f32
    %229 = vector.broadcast %cst_109 : f32 to vector<1x64xf32>
    %230 = arith.divf %228, %229 : vector<1x64xf32>
    %231 = vector.broadcast %230 : vector<1x64xf32> to vector<8x64xf32>
    %232 = arith.subf %226, %231 : vector<8x64xf32>
    %233 = arith.mulf %232, %232 : vector<8x64xf32>
    %cst_110 = arith.constant dense<0.000000e+00> : vector<64xf32>
    %234 = vector.multi_reduction <add>, %233, %cst_110 [0] : vector<8x64xf32> to vector<64xf32>
    %235 = vector.shape_cast %234 : vector<64xf32> to vector<1x64xf32>
    %cst_111 = arith.constant 8.000000e+00 : f32
    %236 = vector.broadcast %cst_111 : f32 to vector<1x64xf32>
    %237 = arith.divf %235, %236 : vector<1x64xf32>
    %cst_112 = arith.constant 9.99999974E-6 : f32
    %238 = vector.broadcast %cst_112 : f32 to vector<1x64xf32>
    %239 = arith.addf %237, %238 : vector<1x64xf32>
    %240 = math.rsqrt %239 : vector<1x64xf32>
    %241 = vector.broadcast %240 : vector<1x64xf32> to vector<8x64xf32>
    %242 = arith.mulf %232, %241 : vector<8x64xf32>
    %243 = vector.broadcast %203 : vector<1x64xf32> to vector<8x64xf32>
    %244 = arith.mulf %242, %243 : vector<8x64xf32>
    %245 = vector.broadcast %205 : vector<1x64xf32> to vector<8x64xf32>
    %246 = arith.addf %244, %245 : vector<8x64xf32>
    %247 = vector.extract_strided_slice %199 {offsets = [0, 0, 0], sizes = [1, 1, 32], strides = [1, 1, 1]} : vector<3x1x32xf32> to vector<1x1x32xf32>
    %248 = vector.shape_cast %247 : vector<1x1x32xf32> to vector<1x32xf32>
    %249 = vector.extract_strided_slice %199 {offsets = [1, 0, 0], sizes = [1, 1, 32], strides = [1, 1, 1]} : vector<3x1x32xf32> to vector<1x1x32xf32>
    %250 = vector.shape_cast %249 : vector<1x1x32xf32> to vector<1x32xf32>
    %251 = vector.extract_strided_slice %199 {offsets = [2, 0, 0], sizes = [1, 1, 32], strides = [1, 1, 1]} : vector<3x1x32xf32> to vector<1x1x32xf32>
    %252 = vector.shape_cast %251 : vector<1x1x32xf32> to vector<1x32xf32>
    %253 = arith.truncf %246 : vector<8x64xf32> to vector<8x64xbf16>
    %c0_113 = arith.constant 0 : index
    %c0_114 = arith.constant 0 : index
    %254 = vector.load %arg22[%c0_113, %c0_114] : memref<64x96xbf16, #tpu.memory_space<vmem>>, vector<64x96xbf16>
    %cst_115 = arith.constant dense<0.000000e+00> : vector<8x96xf32>
    %255 = tpu.matmul %253, %254, %cst_115 {dimension_numbers = #tpu.dot_dimension_numbers<[1], [0], [0], [1], [0, 0, 1, 1], [], []>} : vector<8x64xbf16>, vector<64x96xbf16>, vector<8x96xf32> -> vector<8x96xf32>
    %256 = vector.extract_strided_slice %255 {offsets = [0, 0], sizes = [8, 32], strides = [1, 1]} : vector<8x96xf32> to vector<8x32xf32>
    %c0_116 = arith.constant 0 : index
    %c0_117 = arith.constant 0 : index
    %257 = vector.load %arg24[%c0_116, %c0_117] : memref<8x8xf32, #tpu.memory_space<vmem>>, vector<8x8xf32>
    %258 = vector.extract_strided_slice %255 {offsets = [0, 64], sizes = [8, 32], strides = [1, 1]} : vector<8x96xf32> to vector<8x32xf32>
    %cst_118 = arith.constant dense<0.000000e+00> : vector<8x32xf32>
    %259 = tpu.matmul %257, %258, %cst_118 {dimension_numbers = #tpu.dot_dimension_numbers<[1], [0], [0], [1], [0, 0, 1, 1], [], []>} : vector<8x8xf32>, vector<8x32xf32>, vector<8x32xf32> -> vector<8x32xf32>
    %260 = vector.extract_strided_slice %255 {offsets = [0, 32], sizes = [8, 32], strides = [1, 1]} : vector<8x96xf32> to vector<8x32xf32>
    %261 = arith.addf %259, %260 : vector<8x32xf32>
    %c0_119 = arith.constant 0 : index
    %c0_120 = arith.constant 0 : index
    %c0_121 = arith.constant 0 : index
    %262 = vector.load %arg25[%c0_119, %c0_120, %c0_121] : memref<2x16x8xf32, #tpu.memory_space<vmem>>, vector<2x16x8xf32>
    %263 = vector.extract_strided_slice %262 {offsets = [0, 0, 0], sizes = [1, 16, 8], strides = [1, 1, 1]} : vector<2x16x8xf32> to vector<1x16x8xf32>
    %264 = vector.shape_cast %263 : vector<1x16x8xf32> to vector<16x8xf32>
    %cst_122 = arith.constant dense<0.000000e+00> : vector<16x32xf32>
    %265 = tpu.matmul %264, %256, %cst_122 {dimension_numbers = #tpu.dot_dimension_numbers<[1], [0], [0], [1], [0, 0, 1, 1], [], []>} : vector<16x8xf32>, vector<8x32xf32>, vector<16x32xf32> -> vector<16x32xf32>
    %266 = vector.extract_strided_slice %262 {offsets = [1, 0, 0], sizes = [1, 16, 8], strides = [1, 1, 1]} : vector<2x16x8xf32> to vector<1x16x8xf32>
    %267 = vector.shape_cast %266 : vector<1x16x8xf32> to vector<16x8xf32>
    %cst_123 = arith.constant dense<0.000000e+00> : vector<16x32xf32>
    %268 = tpu.matmul %267, %261, %cst_123 {dimension_numbers = #tpu.dot_dimension_numbers<[1], [0], [0], [1], [0, 0, 1, 1], [], []>} : vector<16x8xf32>, vector<8x32xf32>, vector<16x32xf32> -> vector<16x32xf32>
    %269 = arith.addf %265, %268 : vector<16x32xf32>
    %270 = vector.broadcast %248 : vector<1x32xf32> to vector<16x32xf32>
    %271 = arith.addf %269, %270 : vector<16x32xf32>
    %cst_124 = arith.constant 0.000000e+00 : f32
    %272 = vector.broadcast %cst_124 : f32 to vector<16x32xf32>
    %273 = arith.maximumf %271, %272 : vector<16x32xf32>
    %cst_125 = arith.constant dense<0.000000e+00> : vector<32xf32>
    %274 = vector.multi_reduction <add>, %273, %cst_125 [0] : vector<16x32xf32> to vector<32xf32>
    %275 = vector.shape_cast %274 : vector<32xf32> to vector<1x32xf32>
    %cst_126 = arith.constant 1.600000e+01 : f32
    %276 = vector.broadcast %cst_126 : f32 to vector<1x32xf32>
    %277 = arith.divf %275, %276 : vector<1x32xf32>
    %278 = vector.broadcast %277 : vector<1x32xf32> to vector<16x32xf32>
    %279 = arith.subf %273, %278 : vector<16x32xf32>
    %280 = arith.mulf %279, %279 : vector<16x32xf32>
    %cst_127 = arith.constant dense<0.000000e+00> : vector<32xf32>
    %281 = vector.multi_reduction <add>, %280, %cst_127 [0] : vector<16x32xf32> to vector<32xf32>
    %282 = vector.shape_cast %281 : vector<32xf32> to vector<1x32xf32>
    %cst_128 = arith.constant 1.600000e+01 : f32
    %283 = vector.broadcast %cst_128 : f32 to vector<1x32xf32>
    %284 = arith.divf %282, %283 : vector<1x32xf32>
    %cst_129 = arith.constant 9.99999974E-6 : f32
    %285 = vector.broadcast %cst_129 : f32 to vector<1x32xf32>
    %286 = arith.addf %284, %285 : vector<1x32xf32>
    %287 = math.rsqrt %286 : vector<1x32xf32>
    %288 = vector.broadcast %287 : vector<1x32xf32> to vector<16x32xf32>
    %289 = arith.mulf %279, %288 : vector<16x32xf32>
    %290 = vector.broadcast %250 : vector<1x32xf32> to vector<16x32xf32>
    %291 = arith.mulf %289, %290 : vector<16x32xf32>
    %292 = vector.broadcast %252 : vector<1x32xf32> to vector<16x32xf32>
    %293 = arith.addf %291, %292 : vector<16x32xf32>
    %c0_130 = arith.constant 0 : index
    %c0_131 = arith.constant 0 : index
    %c0_132 = arith.constant 0 : index
    %294 = vector.load %arg27[%c0_130, %c0_131, %c0_132] : memref<1x1x4xf32, #tpu.memory_space<vmem>>, vector<1x1x4xf32>
    %295 = vector.shape_cast %294 : vector<1x1x4xf32> to vector<1x4xf32>
    %296 = arith.truncf %293 : vector<16x32xf32> to vector<16x32xbf16>
    %c0_133 = arith.constant 0 : index
    %c0_134 = arith.constant 0 : index
    %297 = vector.load %arg26[%c0_133, %c0_134] : memref<32x12xbf16, #tpu.memory_space<vmem>>, vector<32x12xbf16>
    %cst_135 = arith.constant dense<0.000000e+00> : vector<16x12xf32>
    %298 = tpu.matmul %296, %297, %cst_135 {dimension_numbers = #tpu.dot_dimension_numbers<[1], [0], [0], [1], [0, 0, 1, 1], [], []>} : vector<16x32xbf16>, vector<32x12xbf16>, vector<16x12xf32> -> vector<16x12xf32>
    %299 = vector.extract_strided_slice %298 {offsets = [0, 0], sizes = [16, 4], strides = [1, 1]} : vector<16x12xf32> to vector<16x4xf32>
    %c0_136 = arith.constant 0 : index
    %c0_137 = arith.constant 0 : index
    %300 = vector.load %arg28[%c0_136, %c0_137] : memref<16x16xf32, #tpu.memory_space<vmem>>, vector<16x16xf32>
    %301 = vector.extract_strided_slice %298 {offsets = [0, 8], sizes = [16, 4], strides = [1, 1]} : vector<16x12xf32> to vector<16x4xf32>
    %cst_138 = arith.constant dense<0.000000e+00> : vector<16x4xf32>
    %302 = tpu.matmul %300, %301, %cst_138 {dimension_numbers = #tpu.dot_dimension_numbers<[1], [0], [0], [1], [0, 0, 1, 1], [], []>} : vector<16x16xf32>, vector<16x4xf32>, vector<16x4xf32> -> vector<16x4xf32>
    %303 = vector.extract_strided_slice %298 {offsets = [0, 4], sizes = [16, 4], strides = [1, 1]} : vector<16x12xf32> to vector<16x4xf32>
    %304 = arith.addf %302, %303 : vector<16x4xf32>
    %c0_139 = arith.constant 0 : index
    %c0_140 = arith.constant 0 : index
    %c0_141 = arith.constant 0 : index
    %305 = vector.load %arg29[%c0_139, %c0_140, %c0_141] : memref<2x32x16xf32, #tpu.memory_space<vmem>>, vector<2x32x16xf32>
    %306 = vector.extract_strided_slice %305 {offsets = [0, 0, 0], sizes = [1, 32, 16], strides = [1, 1, 1]} : vector<2x32x16xf32> to vector<1x32x16xf32>
    %307 = vector.shape_cast %306 : vector<1x32x16xf32> to vector<32x16xf32>
    %cst_142 = arith.constant dense<0.000000e+00> : vector<32x4xf32>
    %308 = tpu.matmul %307, %299, %cst_142 {dimension_numbers = #tpu.dot_dimension_numbers<[1], [0], [0], [1], [0, 0, 1, 1], [], []>} : vector<32x16xf32>, vector<16x4xf32>, vector<32x4xf32> -> vector<32x4xf32>
    %309 = vector.extract_strided_slice %305 {offsets = [1, 0, 0], sizes = [1, 32, 16], strides = [1, 1, 1]} : vector<2x32x16xf32> to vector<1x32x16xf32>
    %310 = vector.shape_cast %309 : vector<1x32x16xf32> to vector<32x16xf32>
    %cst_143 = arith.constant dense<0.000000e+00> : vector<32x4xf32>
    %311 = tpu.matmul %310, %304, %cst_143 {dimension_numbers = #tpu.dot_dimension_numbers<[1], [0], [0], [1], [0, 0, 1, 1], [], []>} : vector<32x16xf32>, vector<16x4xf32>, vector<32x4xf32> -> vector<32x4xf32>
    %312 = arith.addf %308, %311 : vector<32x4xf32>
    %313 = vector.broadcast %295 : vector<1x4xf32> to vector<32x4xf32>
    %314 = arith.addf %312, %313 : vector<32x4xf32>
    %cst_144 = arith.constant 0.000000e+00 : f32
    %315 = vector.broadcast %cst_144 : f32 to vector<32x4xf32>
    %316 = arith.subf %315, %314 : vector<32x4xf32>
    %317 = math.exp %316 : vector<32x4xf32>
    %cst_145 = arith.constant 1.000000e+00 : f32
    %318 = vector.broadcast %cst_145 : f32 to vector<32x4xf32>
    %319 = arith.addf %318, %317 : vector<32x4xf32>
    %cst_146 = arith.constant 1.000000e+00 : f32
    %320 = vector.broadcast %cst_146 : f32 to vector<32x4xf32>
    %321 = arith.divf %320, %319 : vector<32x4xf32>
    %c0_147 = arith.constant 0 : index
    %c0_148 = arith.constant 0 : index
    %322 = vector.load %arg30[%c0_147, %c0_148] : memref<2x16xf32, #tpu.memory_space<vmem>>, vector<2x16xf32>
    tpu.vector_store %arg30[%c0_147, %c0_148], %167 {strides = array<i32>} : memref<2x16xf32, #tpu.memory_space<vmem>>, vector<2x16xf32>,
    %c0_149 = arith.constant 0 : index
    %c0_150 = arith.constant 0 : index
    %323 = vector.load %arg31[%c0_149, %c0_150] : memref<32x4xf32, #tpu.memory_space<vmem>>, vector<32x4xf32>
    tpu.vector_store %arg31[%c0_149, %c0_150], %321 {strides = array<i32>} : memref<32x4xf32, #tpu.memory_space<vmem>>, vector<32x4xf32>,
    return
  }
  func.func @transform_0(%arg0: i32) -> (i32, i32) {
    %c0_i32 = arith.constant 0 : i32
    %c0_i32_0 = arith.constant 0 : i32
    %c0_i32_1 = arith.constant 0 : i32
    return %c0_i32, %c0_i32_0 : i32, i32
  }
  func.func @transform_1(%arg0: i32) -> (i32, i32) {
    %c0_i32 = arith.constant 0 : i32
    %c0_i32_0 = arith.constant 0 : i32
    %c0_i32_1 = arith.constant 0 : i32
    return %c0_i32, %c0_i32_0 : i32, i32
  }
  func.func @transform_2(%arg0: i32) -> (i32, i32, i32) {
    %c0_i32 = arith.constant 0 : i32
    %c0_i32_0 = arith.constant 0 : i32
    %c0_i32_1 = arith.constant 0 : i32
    %c0_i32_2 = arith.constant 0 : i32
    return %c0_i32, %c0_i32_0, %c0_i32_1 : i32, i32, i32
  }
  func.func @transform_3(%arg0: i32) -> (i32, i32) {
    %c0_i32 = arith.constant 0 : i32
    %c0_i32_0 = arith.constant 0 : i32
    %c0_i32_1 = arith.constant 0 : i32
    return %c0_i32, %c0_i32_0 : i32, i32
  }
  func.func @transform_4(%arg0: i32) -> (i32, i32, i32) {
    %c0_i32 = arith.constant 0 : i32
    %c0_i32_0 = arith.constant 0 : i32
    %c0_i32_1 = arith.constant 0 : i32
    %c0_i32_2 = arith.constant 0 : i32
    return %c0_i32, %c0_i32_0, %c0_i32_1 : i32, i32, i32
  }
  func.func @transform_5(%arg0: i32) -> (i32, i32, i32) {
    %c0_i32 = arith.constant 0 : i32
    %c0_i32_0 = arith.constant 0 : i32
    %c0_i32_1 = arith.constant 0 : i32
    %c0_i32_2 = arith.constant 0 : i32
    return %c0_i32, %c0_i32_0, %c0_i32_1 : i32, i32, i32
  }
  func.func @transform_6(%arg0: i32) -> (i32, i32) {
    %c0_i32 = arith.constant 0 : i32
    %c0_i32_0 = arith.constant 0 : i32
    %c0_i32_1 = arith.constant 0 : i32
    return %c0_i32, %c0_i32_0 : i32, i32
  }
  func.func @transform_7(%arg0: i32) -> (i32, i32, i32) {
    %c0_i32 = arith.constant 0 : i32
    %c0_i32_0 = arith.constant 0 : i32
    %c0_i32_1 = arith.constant 0 : i32
    %c0_i32_2 = arith.constant 0 : i32
    return %c0_i32, %c0_i32_0, %c0_i32_1 : i32, i32, i32
  }
  func.func @transform_8(%arg0: i32) -> (i32, i32, i32) {
    %c0_i32 = arith.constant 0 : i32
    %c0_i32_0 = arith.constant 0 : i32
    %c0_i32_1 = arith.constant 0 : i32
    %c0_i32_2 = arith.constant 0 : i32
    return %c0_i32, %c0_i32_0, %c0_i32_1 : i32, i32, i32
  }
  func.func @transform_9(%arg0: i32) -> (i32, i32) {
    %c0_i32 = arith.constant 0 : i32
    %c0_i32_0 = arith.constant 0 : i32
    %c0_i32_1 = arith.constant 0 : i32
    return %c0_i32, %c0_i32_0 : i32, i32
  }
  func.func @transform_10(%arg0: i32) -> (i32, i32, i32) {
    %c0_i32 = arith.constant 0 : i32
    %c0_i32_0 = arith.constant 0 : i32
    %c0_i32_1 = arith.constant 0 : i32
    %c0_i32_2 = arith.constant 0 : i32
    return %c0_i32, %c0_i32_0, %c0_i32_1 : i32, i32, i32
  }
  func.func @transform_11(%arg0: i32) -> (i32, i32, i32) {
    %c0_i32 = arith.constant 0 : i32
    %c0_i32_0 = arith.constant 0 : i32
    %c0_i32_1 = arith.constant 0 : i32
    %c0_i32_2 = arith.constant 0 : i32
    return %c0_i32, %c0_i32_0, %c0_i32_1 : i32, i32, i32
  }
  func.func @transform_12(%arg0: i32) -> (i32, i32, i32) {
    %c0_i32 = arith.constant 0 : i32
    %c0_i32_0 = arith.constant 0 : i32
    %c0_i32_1 = arith.constant 0 : i32
    %c0_i32_2 = arith.constant 0 : i32
    return %c0_i32, %c0_i32_0, %c0_i32_1 : i32, i32, i32
  }
  func.func @transform_13(%arg0: i32) -> (i32, i32, i32) {
    %c0_i32 = arith.constant 0 : i32
    %c0_i32_0 = arith.constant 0 : i32
    %c0_i32_1 = arith.constant 0 : i32
    %c0_i32_2 = arith.constant 0 : i32
    return %c0_i32, %c0_i32_0, %c0_i32_1 : i32, i32, i32
  }
  func.func @transform_14(%arg0: i32) -> (i32, i32) {
    %c0_i32 = arith.constant 0 : i32
    %c0_i32_0 = arith.constant 0 : i32
    %c0_i32_1 = arith.constant 0 : i32
    return %c0_i32, %c0_i32_0 : i32, i32
  }
  func.func @transform_15(%arg0: i32) -> (i32, i32, i32) {
    %c0_i32 = arith.constant 0 : i32
    %c0_i32_0 = arith.constant 0 : i32
    %c0_i32_1 = arith.constant 0 : i32
    %c0_i32_2 = arith.constant 0 : i32
    return %c0_i32, %c0_i32_0, %c0_i32_1 : i32, i32, i32
  }
  func.func @transform_16(%arg0: i32) -> (i32, i32, i32) {
    %c0_i32 = arith.constant 0 : i32
    %c0_i32_0 = arith.constant 0 : i32
    %c0_i32_1 = arith.constant 0 : i32
    %c0_i32_2 = arith.constant 0 : i32
    return %c0_i32, %c0_i32_0, %c0_i32_1 : i32, i32, i32
  }
  func.func @transform_17(%arg0: i32) -> (i32, i32) {
    %c0_i32 = arith.constant 0 : i32
    %c0_i32_0 = arith.constant 0 : i32
    %c0_i32_1 = arith.constant 0 : i32
    return %c0_i32, %c0_i32_0 : i32, i32
  }
  func.func @transform_18(%arg0: i32) -> (i32, i32, i32) {
    %c0_i32 = arith.constant 0 : i32
    %c0_i32_0 = arith.constant 0 : i32
    %c0_i32_1 = arith.constant 0 : i32
    %c0_i32_2 = arith.constant 0 : i32
    return %c0_i32, %c0_i32_0, %c0_i32_1 : i32, i32, i32
  }
  func.func @transform_19(%arg0: i32) -> (i32, i32) {
    %c0_i32 = arith.constant 0 : i32
    %c0_i32_0 = arith.constant 0 : i32
    %c0_i32_1 = arith.constant 0 : i32
    return %c0_i32, %c0_i32_0 : i32, i32
  }
  func.func @transform_20(%arg0: i32) -> (i32, i32, i32) {
    %c0_i32 = arith.constant 0 : i32
    %c0_i32_0 = arith.constant 0 : i32
    %c0_i32_1 = arith.constant 0 : i32
    %c0_i32_2 = arith.constant 0 : i32
    return %c0_i32, %c0_i32_0, %c0_i32_1 : i32, i32, i32
  }
  func.func @transform_21(%arg0: i32) -> (i32, i32) {
    %c0_i32 = arith.constant 0 : i32
    %c0_i32_0 = arith.constant 0 : i32
    %c0_i32_1 = arith.constant 0 : i32
    return %c0_i32, %c0_i32_0 : i32, i32
  }
  func.func @transform_22(%arg0: i32) -> (i32, i32, i32) {
    %c0_i32 = arith.constant 0 : i32
    %c0_i32_0 = arith.constant 0 : i32
    %c0_i32_1 = arith.constant 0 : i32
    %c0_i32_2 = arith.constant 0 : i32
    return %c0_i32, %c0_i32_0, %c0_i32_1 : i32, i32, i32
  }
  func.func @transform_23(%arg0: i32) -> (i32, i32) {
    %c0_i32 = arith.constant 0 : i32
    %c0_i32_0 = arith.constant 0 : i32
    %c0_i32_1 = arith.constant 0 : i32
    return %c0_i32, %c0_i32_0 : i32, i32
  }
  func.func @transform_24(%arg0: i32) -> (i32, i32, i32) {
    %c0_i32 = arith.constant 0 : i32
    %c0_i32_0 = arith.constant 0 : i32
    %c0_i32_1 = arith.constant 0 : i32
    %c0_i32_2 = arith.constant 0 : i32
    return %c0_i32, %c0_i32_0, %c0_i32_1 : i32, i32, i32
  }
  func.func @transform_25(%arg0: i32) -> (i32, i32) {
    %c0_i32 = arith.constant 0 : i32
    %c0_i32_0 = arith.constant 0 : i32
    %c0_i32_1 = arith.constant 0 : i32
    return %c0_i32, %c0_i32_0 : i32, i32
  }
  func.func @transform_26(%arg0: i32) -> (i32, i32, i32) {
    %c0_i32 = arith.constant 0 : i32
    %c0_i32_0 = arith.constant 0 : i32
    %c0_i32_1 = arith.constant 0 : i32
    %c0_i32_2 = arith.constant 0 : i32
    return %c0_i32, %c0_i32_0, %c0_i32_1 : i32, i32, i32
  }
  func.func @transform_27(%arg0: i32) -> (i32, i32) {
    %c0_i32 = arith.constant 0 : i32
    %c0_i32_0 = arith.constant 0 : i32
    %c0_i32_1 = arith.constant 0 : i32
    return %c0_i32, %c0_i32_0 : i32, i32
  }
  func.func @transform_28(%arg0: i32) -> (i32, i32, i32) {
    %c0_i32 = arith.constant 0 : i32
    %c0_i32_0 = arith.constant 0 : i32
    %c0_i32_1 = arith.constant 0 : i32
    %c0_i32_2 = arith.constant 0 : i32
    return %c0_i32, %c0_i32_0, %c0_i32_1 : i32, i32, i32
  }
  func.func @transform_29(%arg0: i32) -> (i32, i32) {
    %c0_i32 = arith.constant 0 : i32
    %c0_i32_0 = arith.constant 0 : i32
    %c0_i32_1 = arith.constant 0 : i32
    return %c0_i32, %c0_i32_0 : i32, i32
  }
  func.func @transform_30(%arg0: i32) -> (i32, i32) {
    %c0_i32 = arith.constant 0 : i32
    %c0_i32_0 = arith.constant 0 : i32
    %c0_i32_1 = arith.constant 0 : i32
    return %c0_i32, %c0_i32_0 : i32, i32
  }
}

</mosaic_0001>

<bundles_post_ra>
// kernel: audio_vae_forward.1
= control target key start
LH: loop header
LB: loop body
LE: loop exit
PB: predicated region body
PF: predicated region fallthrough
CT: control target
= control target key end

     0   :  { %s3907_s3 = smov 3   ;;  %vm140_vm0 = vcmask 1041408   ;;  %vm133_vm1 = vcmask 31744   ;;  %s3908_s10 = smov 2   ;;  %vm218_vm2 = vcmask 261120   ;;  %v3912_v42 = vmov 0   ;;  %s4258_s0 = inlined_call_operand.smem [shape: u32[31], index: -1, kind: input, shape index: {}] }
   0x1   :  { %s3171_s6 = sld [smem:[%s4258_s0 + %s3907_s3]]   ;;  %s3909_s14 = smov 64   ;;  %vm3915_vm3 = vmmov 0   ;;  %vm616_vm4 = vcmask 130048   ;;  %vm845_vm5 = vcmask 523264   ;;  %vm1053_vm6 = vcmask 64512  }
   0x2   :  { %s1_s9 = sld [smem:[%s4258_s0]]   ;;  %s3910_s15 = smov 96   ;;  %vm1282_vm7 = vcmask 1043456   ;;  %vm3155_vm8 = vcmask 123904   ;;  %vm1809_vm9 = vcmask 15360  }
   0x3   :  { %s3963_s13 = sld [smem:[%s4258_s0 + %s3908_s10]]   ;;  %s3911_s16 = smov 6  }
   0x4   :  { %s3174_s19 = sld [smem:[%s4258_s0 + %s3911_s16]]   ;;  %s3913_s20 = smov 4  }
   0x5   :  { %s3988_s23 = sld [smem:[%s4258_s0 + %s3913_s20]]   ;;  %s3917_s24 = smov 5  }
   0x6   :  { %s3173_s27 = sld [smem:[%s4258_s0 + %s3917_s24]]   ;;  %s3918_s28 = smov 9  }
   0x7   :  { %v132_v0 = vld [vmem:[%s3171_s6] sm:$0x3]  ;;  %s3177_s1 = sld [smem:[%s4258_s0 + %s3918_s28]]   ;;  %s3919_s2 = smov 7  }
   0x8   :  { %v126_v1 = vld [vmem:[%s1_s9] sm:$0xff]  ;;  %v127_v2 = vld [vmem:[%s1_s9 + $0x8] sm:$0xff]  ;;  %3742 = vmatprep.subr.msk.bf16.mxu0 %vm140_vm0, %v132_v0  ;;  %v142_v3 = vsel %vm140_vm0, %v132_v0, 0  ;;  %v128_v5 = vld [vmem:[%s1_s9 + $0x10] sm:$0xff]  ;;  %s4026_s5 = sld [smem:[%s4258_s0 + %s3919_s2]]   ;;  %s3920_s6 = smov 8  }
   0x9   :  { %v130_v4 = vpack.c.bf16 %v127_v2, %v126_v1  ;;  %v129_v6 = vld [vmem:[%s1_s9 + $0x18] sm:$0xff]  ;;  %3450 = vmatpush3.bf16.msra.mxu0 %v142_v3  ;;  %v195_v14 = vld [vmem:[%s3963_s13 + $0x10] sm:$0xff]  ;;  %v193_v27 = vld [vmem:[%s3963_s13] sm:$0xff]  ;;  %s3176_s9 = sld [smem:[%s4258_s0 + %s3920_s6]]   ;;  %s3921_s10 = smov 13  }
   0xa   :  { %v131_v7 = vpack.c.bf16 %v129_v6, %v128_v5  ;;  %3463 = vmatprep.mubr.msk.f32.mxu1 %vm218_vm2, %v195_v14  ;;  %v196_v26 = vld [vmem:[%s3963_s13 + $0x18] sm:$0xff]  ;;  %v194_v34 = vld [vmem:[%s3963_s13 + $0x8] sm:$0xff]  ;;  %v197_v35 = vld [vmem:[%s3963_s13 + $0x20] sm:$0xff]  ;;  %s3922_s16 = smov 10   ;;  %s3923_s20 = smov 11  }
   0xb   :  { %3451 = vmatprep.mubr.msk.bf16.mxu0 %vm133_vm1, %v130_v4  ;;  %v198_v37 = vld [vmem:[%s3963_s13 + $0x28] sm:$0xff]  ;;  %v3816_v40 = vld [vmem:[%s3174_s19 + $0x14] ss:$8 sps:$4 sm:$0xff]   ;;  %v3814_v41 = vld [vmem:[%s3174_s19 + $0x10] ss:$8 sps:$4 sm:$0xff]   ;;  %s4057_s13 = sld [smem:[%s4258_s0 + %s3921_s10]]   ;;  %s3924_s24 = smov 14  }
   0xc   :  { %3452 = vmatmul.mubr.msk.bf16.vlgmr.msra.gmra.mrb[0].mxu0 %vm133_vm1, %v131_v7  ;;  %v3813_v38 = vld [vmem:[%s3174_s19 + $0x4] ss:$8 sps:$4 sm:$0xff]   ;;  %v3811_v39 = vld [vmem:[%s3174_s19] ss:$8 sps:$4 sm:$0xff]   ;;  %s4062_s19 = sld [smem:[%s4258_s0 + %s3922_s16]]   ;;  %s3925_s28 = smov 29  }
   0xd   :  { %v3207_v43 = vld [vmem:[%s3988_s23] ss:$0 sm:$0xff]  ;;  %s3926_s2 = smov 15   ;;  %s3927_s6 = smov 120  }
   0xe   :  { %s3928_s7 = smov 1   ;;  %s3929_s11 = smov 17  }
   0xf   :  { %s3169_s10 = sld [smem:[%s4258_s0 + %s3928_s7]]   ;;  %s3930_s17 = smov 16  }
  0x10   :  { %s3185_s16 = sld [smem:[%s4258_s0 + %s3929_s11]]   ;;  %s3931_s21 = smov 12  }
  0x11   :  { %s3932_s25 = smov 19   ;;  %s3933_s29 = smov 20  }
  0x12   :  { %s3934_s3 = smov 21   ;;  %s3935_s8 = smov 18  }
  0x13   :  { %s3189_s7 = sld [smem:[%s4258_s0 + %s3934_s3]]   ;;  %s3936_s12 = smov 23  }
  0x14   :  { %s4191_s11 = sld [smem:[%s4258_s0 + %s3935_s8]]   ;;  %s3937_s18 = smov 24  }
  0x15   :  { %s3942_s3 = smov 28  }
  0xdf   :  { %v3453_v8 = vpop.f32.mrb[0].mxu0 }
  0xe0   :  { %v178_v9 = vpop.f32.mrb[1].mxu0 }
  0xe1   :  { %v3454_v10 = vpop.f32.mrb[2].mxu0 }
  0xe2   :  { %v3796_v11 = vpack.i.bf16 %v3454_v10, %v3453_v8  ;;  %v3697_v12 = vpack.c.bf16 %v3454_v10, %v3453_v8  ;;  %v181_v13 = vpop.f32.mrb[3].mxu0 }
  0xe3   :  { %v3693_v15 = vpack.c.bf16 %v181_v13, %v178_v9  ;;  %v3791_v16 = vpack.i.bf16 %v181_v13, %v178_v9 }
  0xe5   :  { %3792 = vrot.lane.b32.xlu1 %v3791_v16, %s3909_s14  ;;  %3782 = vrot.lane.b32.xlu0 %v3791_v16, %s3910_s15 }
  0xe9   :  { %3797 = vrot.lane.b32.xlu1 %v3796_v11, %s3909_s14  ;;  %3787 = vrot.lane.b32.xlu0 %v3796_v11, %s3910_s15 }
 0x157   :  { %v3783_v17 = vpop.permute.xlu0 %3782  ;;  %v3793_v25 = vpop.permute.xlu1 %3792 }
 0x158   :  { %v3785_v18 = vunpack.i.h.bf16 %v3783_v17  ;;  %v3784_v19 = vunpack.i.l.bf16 %v3783_v17  ;;  %v3795_v28 = vunpack.i.h.bf16 %v3793_v25  ;;  %v3794_v29 = vunpack.i.l.bf16 %v3793_v25 }
 0x15a   :  { %v3685_v20 = vpack.c.bf16 %v3785_v18, %v3784_v19  ;;  %v3701_v31 = vpack.c.bf16 %v3795_v28, %v3794_v29 }
 0x15b   :  { %v3788_v21 = vpop.permute.xlu0 %3787  ;;  %v3798_v30 = vpop.permute.xlu1 %3797 }
 0x15c   :  { %v3790_v22 = vunpack.i.h.bf16 %v3788_v21  ;;  %v3789_v23 = vunpack.i.l.bf16 %v3788_v21  ;;  %3686 = vmatprep.subr.bf16.mxu1 %v3685_v20  ;;  %v3800_v32 = vunpack.i.h.bf16 %v3798_v30  ;;  %v3799_v33 = vunpack.i.l.bf16 %v3798_v30 }
 0x15d   :  { %3688 = vmatpush3.bf16.msra.mxu1 %v3685_v20  ;;  %v3914_v21 = vmov 0.0|0.0  }
 0x15e   :  { %v3689_v24 = vpack.c.bf16 %v3790_v22, %v3789_v23  ;;  %v3705_v36 = vpack.c.bf16 %v3800_v32, %v3799_v33  ;;  %3709 = vmatprep.subr.bf16.mxu0 %v3914_v21  ;;  %v3916_v22 = vmov 0.0  }
 0x15f   :  { %3492 = vmatprep.mubr.msk.f32.mxu0 %vm3915_vm3, %v3916_v22 }
 0x160   :  { %3690 = vmatprep.subr.bf16.mxu1 %v3689_v24 }
 0x161   :  { %3692 = vmatpush3.bf16.msra.mxu1 %v3689_v24 }
 0x162   :  { %3694 = vmatprep.subr.bf16.mxu1 %v3693_v15 }
 0x164   :  { %3464 = vmatmul.mubr.msk.f32.vlgmr.msra.gmra.mrb[0].mxu1 %vm218_vm2, %v196_v26 }
 0x165   :  { %3696 = vmatpush3.bf16.msra.mxu1 %v3693_v15  ;;  %3474 = vmatprep.mubr.msk.f32.mxu1 %vm218_vm2, %v193_v27  ;;  %v3209_v15 = vld [vmem:[%s3988_s23 + $0x2] ss:$0 sm:$0xff] }
 0x166   :  { %3698 = vmatprep.subr.bf16.mxu1 %v3697_v12 }
 0x169   :  { %3700 = vmatpush3.bf16.msra.mxu1 %v3697_v12  ;;  %v3208_v12 = vld [vmem:[%s3988_s23 + $0x1] ss:$0 sm:$0xff]  ;;  %s3179_s23 = sld [smem:[%s4258_s0 + %s3923_s20]]  }
 0x16a   :  { %3702 = vmatprep.subr.bf16.mxu1 %v3701_v31  ;;  %s3184_s20 = sld [smem:[%s4258_s0 + %s3930_s17]]  }
 0x16b   :  { %s3191_s17 = sld [smem:[%s4258_s0 + %s3936_s12]]  }
 0x16c   :  { %3475 = vmatmul.mubr.msk.f32.vlgmr.msra.gmra.mrb[0].mxu1 %vm218_vm2, %v194_v34  ;;  %v603_v34 = vld [vmem:[%s3173_s27 + $0x8] sm:$0xff] }
 0x16d   :  { %3704 = vmatpush3.bf16.msra.mxu1 %v3701_v31  ;;  %3485 = vmatprep.mubr.msk.f32.mxu1 %vm218_vm2, %v197_v35  ;;  %v602_v35 = vld [vmem:[%s3173_s27] sm:$0xff] }
 0x16e   :  { %3706 = vmatprep.subr.bf16.mxu1 %v3705_v36 }
 0x171   :  { %3708 = vmatpush3.bf16.msra.mxu1 %v3705_v36  ;;  %v604_v36 = vld [vmem:[%s3173_s27 + $0x10] sm:$0xff]  ;;  %s3182_s27 = sld [smem:[%s4258_s0 + %s3924_s24]]  }
 0x172   :  { %559 = vmatprep.subr.bf16.mxu1 %v3813_v38  ;;  %v3817_v38 = vld [vmem:[%s3177_s1] ss:$12 sps:$4 sm:$0xff]   ;;  %s3180_s24 = sld [smem:[%s4258_s0 + %s3931_s21]]  }
 0x174   :  { %3486 = vmatmul.mubr.msk.f32.vlgmr.msra.gmra.mrb[0].mxu1 %vm218_vm2, %v198_v37  ;;  %v3819_v37 = vld [vmem:[%s3177_s1 + $0x4] ss:$12 sps:$4 sm:$0xff]  }
 0x175   :  { %560 = vmatpush1.bf16.msra.mxu1 %v3811_v39  ;;  %591 = vmatprep.mubr.bf16.mxu1 %v3912_v42  ;;  %v3820_v39 = vld [vmem:[%s3177_s1 + $0x8] ss:$12 sps:$4 sm:$0xff]  }
 0x176   :  { %561 = vmatprep.subr.bf16.mxu1 %v3816_v40  ;;  %v3823_v40 = vld [vmem:[%s3177_s1 + $0x1c] ss:$12 sps:$4 sm:$0xff]  }
 0x179   :  { %562 = vmatpush1.bf16.msra.mxu1 %v3814_v41  ;;  %v3821_v41 = vld [vmem:[%s3177_s1 + $0x18] ss:$12 sps:$4 sm:$0xff]  }
 0x17a   :  { %966 = vmatprep.subr.bf16.mxu1 %v3819_v37 }
 0x247   :  { %v3487_v44 = vpop.f32.mrb[0].mxu1 }
 0x248   :  { %v483_v45 = vadd.f32 %v3487_v44, %v3207_v43  ;;  %v465_v46 = vpop.f32.mrb[1].mxu1  ;;  %v3827_v44 = vld [vmem:[%s3177_s1 + $0x34] ss:$12 sps:$4 sm:$0xff]  }
 0x249   :  { %v482_v47 = vadd.f32 %v3207_v43, %v465_v46  ;;  %v3824_v43 = vld [vmem:[%s3177_s1 + $0x20] ss:$12 sps:$4 sm:$0xff]   ;;  %v3828_v46 = vld [vmem:[%s3177_s1 + $0x38] ss:$12 sps:$4 sm:$0xff]  }
 0x24a   :  { %v485_v48 = vmax.f32 %v483_v45, 0.0  ;;  %v3825_v45 = vld [vmem:[%s3177_s1 + $0x30] ss:$12 sps:$4 sm:$0xff]  }
 0x24b   :  { %v484_v49 = vmax.f32 %v482_v47, 0.0  ;;  %v3831_v47 = vld [vmem:[%s3177_s1 + $0x4c] ss:$12 sps:$4 sm:$0xff]  }
 0x24c   :  { %v487_v50 = vsel %vm218_vm2, %v485_v48, 0.0 }
 0x24d   :  { %v486_v51 = vsel %vm218_vm2, %v484_v49, 0.0 }
 0x24e   :  { %v488_v52 = vadd.f32 %v487_v50, %v486_v51 }
 0x250   :  { %v489_v53 = vrot.slane %v488_v52, 4 }
 0x252   :  { %v490_v54 = vadd.f32 %v489_v53, %v488_v52 }
 0x254   :  { %v491_v55 = vrot.slane %v490_v54, 2 }
 0x256   :  { %v492_v56 = vadd.f32 %v491_v55, %v490_v54  ;;  %v3218_v55 = vld [vmem:[%s4026_s5] ss:$0 sm:$0xff] }
 0x258   :  { %v493_v57 = vrot.slane %v492_v56, 1 }
 0x25a   :  { %v494_v58 = vadd.f32 %v493_v57, %v492_v56 }
 0x25c   :  { %v496_v59 = vmul.f32 0.0625, %v494_v58 }
 0x25e   :  { %v497_v60 = vsub.f32 %v484_v49, %v496_v59  ;;  %v498_v61 = vsub.f32 %v485_v48, %v496_v59  ;;  %v3829_v48 = vld [vmem:[%s3177_s1 + $0x48] ss:$12 sps:$4 sm:$0xff]   ;;  %v3832_v49 = vld [vmem:[%s3177_s1 + $0x50] ss:$12 sps:$4 sm:$0xff]   ;;  %s3197_s1 = sld [smem:[%s4258_s0 + %s3925_s28]]  }
 0x25f   :  { %s3187_s28 = sld [smem:[%s4258_s0 + %s3932_s25]]  }
 0x260   :  { %v499_v62 = vmul.f32 %v497_v60, %v497_v60  ;;  %v500_v63 = vmul.f32 %v498_v61, %v498_v61 }
 0x262   :  { %v501_v0 = vsel %vm218_vm2, %v499_v62, 0.0  ;;  %v502_v1 = vsel %vm218_vm2, %v500_v63, 0.0 }
 0x263   :  { %v503_v2 = vadd.f32 %v502_v1, %v501_v0 }
 0x265   :  { %v504_v3 = vrot.slane %v503_v2, 4 }
 0x267   :  { %v505_v4 = vadd.f32 %v504_v3, %v503_v2 }
 0x269   :  { %v506_v5 = vrot.slane %v505_v4, 2 }
 0x26b   :  { %v507_v6 = vadd.f32 %v506_v5, %v505_v4 }
 0x26d   :  { %v508_v7 = vrot.slane %v507_v6, 1 }
 0x26f   :  { %v509_v8 = vadd.f32 %v508_v7, %v507_v6 }
 0x271   :  { %v510_v9 = vmul.f32 0.0625, %v509_v8 }
 0x273   :  { %v511_v10 = vadd.f32 1e-05, %v510_v9 }
 0x275   :  { %3879 = vrsqrt.f32 %v511_v10 }
 0x27f   :  { %v3880_v11 = vpop.eup %3879 }
 0x280   :  { %v513_v13 = vmul.f32 %v3880_v11, %v497_v60  ;;  %v514_v14 = vmul.f32 %v3880_v11, %v498_v61 }
 0x282   :  { %v521_v16 = vmul.f32 %v3208_v12, %v513_v13  ;;  %v522_v17 = vmul.f32 %v3208_v12, %v514_v14 }
 0x284   :  { %v529_v18 = vadd.f32 %v3209_v15, %v521_v16  ;;  %v530_v19 = vadd.f32 %v3209_v15, %v522_v17  ;;  %v3219_v17 = vld [vmem:[%s4026_s5 + $0x1] ss:$0 sm:$0xff] }
 0x286   :  { %v531_v20 = vpack.c.bf16 %v530_v19, %v529_v18  ;;  %v3220_v19 = vld [vmem:[%s4026_s5 + $0x2] ss:$0 sm:$0xff]  ;;  %s3183_s5 = sld [smem:[%s4258_s0 + %s3926_s2]]  }
 0x287   :  { %s3188_s2 = sld [smem:[%s4258_s0 + %s3933_s29]]  }
 0x288   :  { %3214 = vmatmul.mubr.msk.bf16.vlgmr.msra.gmra.mrb[4].mxu1 %vm218_vm2, %v531_v20 }
 0x289   :  { %998 = vmatprep.mubr.bf16.mxu1 %v3912_v42  ;;  %967 = vmatpush1.bf16.msra.mxu1 %v3817_v38 }
 0x28a   :  { %968 = vmatprep.subr.bf16.mxu1 %v3823_v40  ;;  %v3238_v40 = vld [vmem:[%s4062_s19] ss:$0 sm:$0xff] }
 0x28d   :  { %969 = vmatpush1.bf16.msra.mxu1 %v3821_v41 }
 0x28e   :  { %970 = vmatprep.subr.bf16.mxu1 %v3827_v44 }
 0x291   :  { %971 = vmatpush1.bf16.msra.mxu1 %v3825_v45 }
 0x292   :  { %972 = vmatprep.subr.bf16.mxu1 %v3831_v47 }
 0x295   :  { %973 = vmatpush1.bf16.msra.mxu1 %v3829_v48 }
 0x296   :  { %3521 = vmatprep.subr.mxu1 %v3916_v22 }
 0x35b   :  { %v593_v23 = vpop.f32.mrb[4].mxu1 }
 0x35c   :  { %v595_v24 = vpop.f32.mrb[5].mxu1 }
 0x35d   :  { %v597_v25 = vpop.f32.mrb[6].mxu1 }
 0x35e   :  { %v3801_v26 = vpack.i.bf16 %v597_v25, %v593_v23  ;;  %v3713_v27 = vpack.c.bf16 %v597_v25, %v593_v23  ;;  %v599_v28 = vpop.f32.mrb[7].mxu1 }
 0x35f   :  { %v3716_v29 = vpack.c.bf16 %v599_v28, %v595_v24  ;;  %v1047_v24 = vld [vmem:[%s3176_s9] sm:$0xf] }
 0x360   :  { %3802 = vrot.lane.b32.xlu0 %v3801_v26, %s3909_s14 }
 0x3d2   :  { %v3803_v30 = vpop.permute.xlu0 %3802 }
 0x3d3   :  { %v3805_v31 = vunpack.i.h.bf16 %v3803_v30  ;;  %v3804_v32 = vunpack.i.l.bf16 %v3803_v30 }
 0x3d5   :  { %v3710_v33 = vpack.c.bf16 %v3805_v31, %v3804_v32 }
 0x3d7   :  { %3711 = vmatpush3.bf16.msra.mxu0 %v3710_v33 }
 0x3d8   :  { %3712 = vmatprep.subr.bf16.mxu0 %v3914_v21 }
 0x3da   :  { %3493 = vmatmul.mubr.msk.f32.vlgmr.msra.gmra.mrb[4].mxu0 %vm616_vm4, %v603_v34  ;;  %v1049_v34 = vld [vmem:[%s3176_s9 + $0x8] sm:$0xf] }
 0x3db   :  { %3714 = vmatpush3.bf16.msra.mxu0 %v3713_v27  ;;  %3499 = vmatprep.mubr.msk.f32.mxu0 %vm3915_vm3, %v3916_v22  ;;  %v1048_v27 = vld [vmem:[%s3176_s9 + $0x4] sm:$0xf] }
 0x3dc   :  { %3715 = vmatprep.subr.bf16.mxu0 %v3914_v21 }
 0x3de   :  { %3500 = vmatmul.mubr.msk.f32.vlgmr.msra.gmra.mrb[6].mxu0 %vm616_vm4, %v602_v35 }
 0x3df   :  { %3717 = vmatpush3.bf16.msra.mxu0 %v3716_v29  ;;  %3506 = vmatprep.mubr.msk.f32.mxu0 %vm3915_vm3, %v3916_v22 }
 0x3e0   :  { %3509 = vmatprep.subr.bf16.mxu0 %v3916_v22 }
 0x3e2   :  { %3507 = vmatmul.mubr.msk.f32.vlgmr.msra.gmra.mrb[8].mxu0 %vm616_vm4, %v604_v36 }
 0x3e3   :  { %3517 = vmatprep.mubr.msk.bf16.mxu0 %vm3915_vm3, %v3916_v22  ;;  %3510 = vmatpush3.bf16.msra.mxu0 %v3820_v39 }
 0x3e4   :  { %3511 = vmatprep.subr.bf16.mxu0 %v3916_v22 }
 0x3e7   :  { %3512 = vmatpush3.bf16.msra.mxu0 %v3824_v43 }
 0x3e8   :  { %3513 = vmatprep.subr.bf16.mxu0 %v3916_v22 }
 0x3eb   :  { %3514 = vmatpush3.bf16.msra.mxu0 %v3828_v46 }
 0x3ec   :  { %3515 = vmatprep.subr.bf16.mxu0 %v3916_v22 }
 0x3ef   :  { %3516 = vmatpush3.bf16.msra.mxu0 %v3832_v49 }
 0x3f0   :  { %3526 = vmatprep.subr.mxu0 %v3916_v22 }
 0x4ad   :  { %v686_v50 = vpop.f32.mrb[4].mxu0 }
 0x4ae   :  { %v3494_v51 = vpop.f32.mrb[5].mxu0 }
 0x4b1   :  { %v759_v52 = vpop.f32.mrb[6].mxu0 }
 0x4b2   :  { %v760_v53 = vadd.f32 %v759_v52, %v686_v50  ;;  %v3501_v54 = vpop.f32.mrb[7].mxu0 }
 0x4b5   :  { %v832_v56 = vpop.f32.mrb[8].mxu0 }
 0x4b6   :  { %v836_v57 = vadd.f32 %v832_v56, %v760_v53  ;;  %v3508_v58 = vpop.f32.mrb[9].mxu0 }
 0x4b8   :  { %v843_v59 = vadd.f32 %v3218_v55, %v836_v57 }
 0x4ba   :  { %v844_v60 = vmax.f32 %v843_v59, 0.0 }
 0x4bc   :  { %v846_v61 = vsel %vm845_vm5, %v844_v60, 0.0 }
 0x4bd   :  { %v847_v62 = vrot.slane %v846_v61, 4 }
 0x4bf   :  { %v848_v63 = vadd.f32 %v847_v62, %v846_v61 }
 0x4c1   :  { %v849_v0 = vrot.slane %v848_v63, 2 }
 0x4c3   :  { %v850_v1 = vadd.f32 %v849_v0, %v848_v63 }
 0x4c5   :  { %v851_v2 = vrot.slane %v850_v1, 1 }
 0x4c7   :  { %v852_v3 = vadd.f32 %v851_v2, %v850_v1 }
 0x4c9   :  { %v854_v4 = vmul.f32 0.125, %v852_v3  ;;  %v3239_v3 = vld [vmem:[%s4062_s19 + $0x1] ss:$0 sm:$0xff] }
 0x4cb   :  { %v855_v5 = vsub.f32 %v844_v60, %v854_v4 }
 0x4cd   :  { %v856_v6 = vmul.f32 %v855_v5, %v855_v5 }
 0x4cf   :  { %v857_v7 = vsel %vm845_vm5, %v856_v6, 0.0 }
 0x4d0   :  { %v858_v8 = vrot.slane %v857_v7, 4 }
 0x4d2   :  { %v859_v9 = vadd.f32 %v858_v8, %v857_v7  ;;  %v1319_v8 = vld [vmem:[%s3179_s23] sm:$0x3] }
 0x4d4   :  { %v860_v10 = vrot.slane %v859_v9, 2 }
 0x4d6   :  { %v861_v11 = vadd.f32 %v860_v10, %v859_v9  ;;  %v1320_v9 = vld [vmem:[%s3179_s23 + $0x2] sm:$0x3] }
 0x4d7   :  { %v3833_v10 = vld [vmem:[%s4057_s13 + $0x40] sm:$0xff]  }
 0x4d8   :  { %v862_v12 = vrot.slane %v861_v11, 1 }
 0x4da   :  { %v863_v13 = vadd.f32 %v862_v12, %v861_v11  ;;  %v3834_v11 = vld [vmem:[%s4057_s13] sm:$0xff]   ;;  %v3835_v12 = vld [vmem:[%s4057_s13 + $0x48] sm:$0xff]  }
 0x4dc   :  { %v864_v14 = vmul.f32 0.125, %v863_v13  ;;  %v3836_v13 = vld [vmem:[%s4057_s13 + $0x8] sm:$0xff]  }
 0x4de   :  { %v865_v15 = vadd.f32 1e-05, %v864_v14  ;;  %v3837_v14 = vld [vmem:[%s4057_s13 + $0x50] sm:$0xff]  }
 0x4e0   :  { %3881 = vrsqrt.f32 %v865_v15  ;;  %v3838_v15 = vld [vmem:[%s4057_s13 + $0x10] sm:$0xff]  }
 0x4ea   :  { %v3882_v16 = vpop.eup %3881 }
 0x4eb   :  { %v867_v18 = vmul.f32 %v3882_v16, %v855_v5  ;;  %v3240_v5 = vld [vmem:[%s4062_s19 + $0x2] ss:$0 sm:$0xff]  ;;  %v3839_v16 = vld [vmem:[%s4057_s13 + $0x58] sm:$0xff]  }
 0x4ed   :  { %v874_v20 = vmul.f32 %v3219_v17, %v867_v18  ;;  %v3840_v17 = vld [vmem:[%s4057_s13 + $0x18] sm:$0xff]   ;;  %v3841_v18 = vld [vmem:[%s4057_s13 + $0x60] sm:$0xff]  }
 0x4ef   :  { %v881_v21 = vadd.f32 %v3220_v19, %v874_v20  ;;  %v3842_v19 = vld [vmem:[%s4057_s13 + $0x20] sm:$0xff]   ;;  %v3843_v20 = vld [vmem:[%s4057_s13 + $0x68] sm:$0xff]  }
 0x4f1   :  { %v882_v23 = vpack.c.bf16 %v881_v21, %v881_v21  ;;  %v3844_v21 = vld [vmem:[%s4057_s13 + $0x28] sm:$0xff]  }
 0x4f3   :  { %3233 = vmatmul.mubr.msk.bf16.vlgmr.msra.gmra.mrb[8].mxu1 %vm845_vm5, %v882_v23  ;;  %3518 = vmatmul.mubr.msk.bf16.vlgmr.msra.gmra.mrb[12].mxu0 %vm845_vm5, %v882_v23  ;;  %v3845_v23 = vld [vmem:[%s4057_s13 + $0x70] sm:$0xff]  }
 0x4f4   :  { %3523 = vmatprep.mubr.msk.f32.mxu1 %vm3915_vm3, %v3916_v22  ;;  %3528 = vmatprep.mubr.msk.f32.mxu0 %vm3915_vm3, %v3916_v22 }
 0x5c6   :  { %v1000_v25 = vpop.f32.mrb[8].mxu1  ;;  %v1041_v26 = vpop.f32.mrb[12].mxu0 }
 0x5c7   :  { %v1002_v28 = vpop.f32.mrb[9].mxu1  ;;  %v3519_v29 = vpop.f32.mrb[13].mxu0  ;;  %3527 = vmatpush3.msra.mxu0 %v1000_v25  ;;  %v3847_v25 = vld [vmem:[%s4057_s13 + $0x78] sm:$0xff]  }
 0x5c8   :  { %v1004_v30 = vpop.f32.mrb[10].mxu1  ;;  %v1044_v31 = vpop.f32.mrb[14].mxu0  ;;  %3522 = vmatpush3.msra.mxu1 %v1002_v28  ;;  %3529 = vmatmul.mubr.msk.f32.vlgmr.msra.gmra.mrb[10].mxu0 %vm1053_vm6, %v1047_v24  ;;  %v3846_v24 = vld [vmem:[%s4057_s13 + $0x30] sm:$0xff]  }
 0x5c9   :  { %v1005_v32 = vpop.f32.mrb[11].mxu1  ;;  %v3520_v33 = vpop.f32.mrb[15].mxu0  ;;  %3524 = vmatmul.mubr.msk.f32.vlgmr.msra.gmra.mrb[2].mxu1 %vm1053_vm6, %v1048_v27  ;;  %3531 = vmatprep.subr.mxu1 %v3916_v22 }
 0x5ca   :  { %3532 = vmatpush3.msra.mxu1 %v1041_v26  ;;  %3533 = vmatprep.mubr.msk.f32.mxu1 %vm3915_vm3, %v3916_v22  ;;  %v3848_v26 = vld [vmem:[%s4057_s13 + $0x38] sm:$0xff]  }
 0x5cb   :  { %3536 = vmatprep.subr.mxu0 %v3916_v22  ;;  %3541 = vmatprep.subr.mxu1 %v3916_v22 }
 0x5cc   :  { %3538 = vmatprep.mubr.msk.f32.mxu0 %vm3915_vm3, %v3916_v22 }
 0x5cd   :  { %3534 = vmatmul.mubr.msk.f32.vlgmr.msra.gmra.mrb[12].mxu1 %vm1053_vm6, %v1049_v34 }
 0x5ce   :  { %3543 = vmatprep.mubr.msk.f32.mxu1 %vm3915_vm3, %v3916_v22 }
 0x69b   :  { %v1196_v35 = vpop.f32.mrb[10].mxu0 }
 0x69c   :  { %v1123_v36 = vpop.f32.mrb[2].mxu1  ;;  %v3530_v37 = vpop.f32.mrb[11].mxu0 }
 0x69d   :  { %v1197_v38 = vadd.f32 %v1196_v35, %v1123_v36  ;;  %v3525_v39 = vpop.f32.mrb[3].mxu1  ;;  %v3277_v35 = vld [vmem:[%s3182_s27] ss:$0 sm:$0xff] }
 0x6a0   :  { %v1269_v41 = vpop.f32.mrb[12].mxu1 }
 0x6a1   :  { %v1273_v43 = vadd.f32 %v1269_v41, %v1197_v38  ;;  %v3535_v44 = vpop.f32.mrb[13].mxu1 }
 0x6a3   :  { %v1280_v45 = vadd.f32 %v3238_v40, %v1273_v43 }
 0x6a5   :  { %v1281_v46 = vmax.f32 %v1280_v45, 0.0 }
 0x6a7   :  { %v1283_v47 = vsel %vm1282_vm7, %v1281_v46, 0.0 }
 0x6a8   :  { %v1284_v48 = vrot.slane %v1283_v47, 4 }
 0x6aa   :  { %v1285_v49 = vadd.f32 %v1284_v48, %v1283_v47  ;;  %v1702_v47 = vld [vmem:[%s3183_s5] sm:$0xf]  ;;  %v3280_v48 = vld [vmem:[%s3183_s5 + $0x4] sm:$0xf] }
 0x6ac   :  { %v1286_v50 = vrot.slane %v1285_v49, 2 }
 0x6ae   :  { %v1287_v51 = vadd.f32 %v1286_v50, %v1285_v49  ;;  %v1714_v49 = vsel %vm1282_vm7, %v1702_v47, 0  ;;  %v1767_v50 = vsel %vm1282_vm7, %v3280_v48, 0 }
 0x6b0   :  { %v1288_v52 = vrot.slane %v1287_v51, 1 }
 0x6b2   :  { %v1289_v53 = vadd.f32 %v1288_v52, %v1287_v51  ;;  %v1691_v52 = vld [vmem:[%s3169_s10] sm:$0x3] }
 0x6b4   :  { %v1291_v54 = vmul.f32 0.25, %v1289_v53 }
 0x6b6   :  { %v1292_v55 = vsub.f32 %v1281_v46, %v1291_v54 }
 0x6b8   :  { %v1293_v56 = vmul.f32 %v1292_v55, %v1292_v55 }
 0x6ba   :  { %v1294_v57 = vsel %vm1282_vm7, %v1293_v56, 0.0 }
 0x6bb   :  { %v1295_v58 = vrot.slane %v1294_v57, 4 }
 0x6bd   :  { %v1296_v59 = vadd.f32 %v1295_v58, %v1294_v57  ;;  %v3849_v57 = vld [vmem:[%s3185_s16] ss:$8 sps:$4 sm:$0xff]   ;;  %v3851_v58 = vld [vmem:[%s3185_s16 + $0x4] ss:$8 sps:$4 sm:$0xff]  }
 0x6bf   :  { %v1297_v60 = vrot.slane %v1296_v59, 2 }
 0x6c1   :  { %v1298_v61 = vadd.f32 %v1297_v60, %v1296_v59  ;;  %v3854_v59 = vld [vmem:[%s3185_s16 + $0x14] ss:$8 sps:$4 sm:$0xff]   ;;  %v3852_v60 = vld [vmem:[%s3185_s16 + $0x10] ss:$8 sps:$4 sm:$0xff]  }
 0x6c3   :  { %v1299_v62 = vrot.slane %v1298_v61, 1 }
 0x6c5   :  { %v1300_v63 = vadd.f32 %v1299_v62, %v1298_v61  ;;  %v3857_v61 = vld [vmem:[%s3185_s16 + $0x24] ss:$8 sps:$4 sm:$0xff]   ;;  %v3855_v62 = vld [vmem:[%s3185_s16 + $0x20] ss:$8 sps:$4 sm:$0xff]  }
 0x6c7   :  { %v1301_v0 = vmul.f32 0.25, %v1300_v63  ;;  %v3860_v63 = vld [vmem:[%s3185_s16 + $0x34] ss:$8 sps:$4 sm:$0xff]  }
 0x6c9   :  { %v1302_v1 = vadd.f32 1e-05, %v1301_v0  ;;  %v3858_v0 = vld [vmem:[%s3185_s16 + $0x30] ss:$8 sps:$4 sm:$0xff]  }
 0x6cb   :  { %3883 = vrsqrt.f32 %v1302_v1  ;;  %v3861_v1 = vld [vmem:[%s3185_s16 + $0x40] ss:$8 sps:$4 sm:$0xff]  }
 0x6d5   :  { %v3884_v2 = vpop.eup %3883 }
 0x6d6   :  { %v1304_v4 = vmul.f32 %v3884_v2, %v1292_v55  ;;  %v3866_v2 = vld [vmem:[%s3185_s16 + $0x54] ss:$8 sps:$4 sm:$0xff]  }
 0x6d8   :  { %v1311_v6 = vmul.f32 %v3239_v3, %v1304_v4  ;;  %v3864_v3 = vld [vmem:[%s3185_s16 + $0x50] ss:$8 sps:$4 sm:$0xff]   ;;  %v3869_v4 = vld [vmem:[%s3185_s16 + $0x64] ss:$8 sps:$4 sm:$0xff]  }
 0x6da   :  { %v1318_v7 = vadd.f32 %v3240_v5, %v1311_v6  ;;  %v3867_v5 = vld [vmem:[%s3185_s16 + $0x60] ss:$8 sps:$4 sm:$0xff]   ;;  %v3872_v6 = vld [vmem:[%s3185_s16 + $0x74] ss:$8 sps:$4 sm:$0xff]  }
 0x6dc   :  { %3537 = vmatpush3.msk.msra.mxu0 %vm1282_vm7, %v1318_v7  ;;  %3542 = vmatpush3.msk.msra.mxu1 %vm1282_vm7, %v1318_v7  ;;  %v3870_v7 = vld [vmem:[%s3185_s16 + $0x70] ss:$8 sps:$4 sm:$0xff]  }
 0x6dd   :  { %3539 = vmatmul.mubr.msk.f32.vlgmr.msra.gmra.mrb[16].mxu0 %vm133_vm1, %v1319_v8  ;;  %3544 = vmatmul.mubr.msk.f32.vlgmr.msra.gmra.mrb[14].mxu1 %vm133_vm1, %v1320_v9  ;;  %v3282_v8 = vld [vmem:[%s3184_s20 + $0x1] ss:$0 sm:$0xff]  ;;  %v3278_v9 = vld [vmem:[%s3184_s20] ss:$0 sm:$0xff] }
 0x6de   :  { %3546 = vmatprep.subr.bf16.mxu0 %v3916_v22  ;;  %3566 = vmatprep.subr.bf16.mxu1 %v3916_v22 }
 0x6df   :  { %3547 = vmatpush3.bf16.msra.mxu0 %v3833_v10  ;;  %3567 = vmatpush3.bf16.msra.mxu1 %v3834_v11 }
 0x6e0   :  { %3548 = vmatprep.subr.bf16.mxu0 %v3916_v22  ;;  %3568 = vmatprep.subr.bf16.mxu1 %v3916_v22 }
 0x6e1   :  { %3562 = vmatprep.mubr.msk.bf16.mxu0 %vm3915_vm3, %v3916_v22  ;;  %3582 = vmatprep.mubr.msk.bf16.mxu1 %vm3915_vm3, %v3916_v22 }
 0x6e3   :  { %3549 = vmatpush3.bf16.msra.mxu0 %v3835_v12  ;;  %3569 = vmatpush3.bf16.msra.mxu1 %v3836_v13 }
 0x6e4   :  { %3550 = vmatprep.subr.bf16.mxu0 %v3916_v22  ;;  %3570 = vmatprep.subr.bf16.mxu1 %v3916_v22 }
 0x6e7   :  { %3551 = vmatpush3.bf16.msra.mxu0 %v3837_v14  ;;  %3571 = vmatpush3.bf16.msra.mxu1 %v3838_v15  ;;  %v1322_v15 = vld [vmem:[%s3180_s24 + $0x4] sm:$0xf] }
 0x6e8   :  { %3552 = vmatprep.subr.bf16.mxu0 %v3916_v22  ;;  %3572 = vmatprep.subr.bf16.mxu1 %v3916_v22 }
 0x6eb   :  { %3553 = vmatpush3.bf16.msra.mxu0 %v3839_v16  ;;  %3573 = vmatpush3.bf16.msra.mxu1 %v3840_v17 }
 0x6ec   :  { %3554 = vmatprep.subr.bf16.mxu0 %v3916_v22  ;;  %3574 = vmatprep.subr.bf16.mxu1 %v3916_v22 }
 0x6ef   :  { %3555 = vmatpush3.bf16.msra.mxu0 %v3841_v18  ;;  %3575 = vmatpush3.bf16.msra.mxu1 %v3842_v19 }
 0x6f0   :  { %3556 = vmatprep.subr.bf16.mxu0 %v3916_v22  ;;  %3576 = vmatprep.subr.bf16.mxu1 %v3916_v22 }
 0x6f3   :  { %3557 = vmatpush3.bf16.msra.mxu0 %v3843_v20  ;;  %3577 = vmatpush3.bf16.msra.mxu1 %v3844_v21  ;;  %v1321_v21 = vld [vmem:[%s3180_s24] sm:$0xf]  ;;  %s3939_s24 = smov 22  }
 0x6f4   :  { %3558 = vmatprep.subr.bf16.mxu0 %v3916_v22  ;;  %3578 = vmatprep.subr.bf16.mxu1 %v3916_v22  ;;  %s4221_s27 = sld [smem:[%s4258_s0 + %s3939_s24]]  }
 0x6f7   :  { %3559 = vmatpush3.bf16.msra.mxu0 %v3845_v23  ;;  %3579 = vmatpush3.bf16.msra.mxu1 %v3846_v24 }
 0x6f8   :  { %3560 = vmatprep.subr.bf16.mxu0 %v3916_v22  ;;  %3580 = vmatprep.subr.bf16.mxu1 %v3916_v22 }
 0x6fb   :  { %3561 = vmatpush3.bf16.msra.mxu0 %v3847_v25  ;;  %3581 = vmatpush3.bf16.msra.mxu1 %v3848_v26 }
 0x6fc   :  { %3586 = vmatprep.subr.bf16.mxu0 %v3916_v22  ;;  %3592 = vmatprep.subr.bf16.mxu1 %v3916_v22 }
 0x7b0   :  { %v1395_v27 = vpop.f32.mrb[16].mxu0  ;;  %v1485_v28 = vpop.f32.mrb[14].mxu1 }
 0x7b1   :  { %v1399_v29 = vpack.c.bf16 %v1395_v27, %v1395_v27  ;;  %v1489_v30 = vpack.c.bf16 %v1485_v28, %v1485_v28  ;;  %v3540_v31 = vpop.f32.mrb[17].mxu0  ;;  %v3545_v32 = vpop.f32.mrb[15].mxu1  ;;  %v2106_v27 = vld [vmem:[%s3187_s28] sm:$0xf]  ;;  %s3940_s28 = smov 27  }
 0x7b3   :  { %3563 = vmatmul.mubr.bf16.vlgmr.msra.gmra.mrb[20].mxu0 %v1489_v30  ;;  %3583 = vmatmul.mubr.bf16.vlgmr.msra.gmra.mrb[16].mxu1 %v1399_v29 }
 0x7b4   :  { %3588 = vmatprep.mubr.msk.bf16.mxu0 %vm3915_vm3, %v3916_v22  ;;  %3594 = vmatprep.mubr.msk.bf16.mxu1 %vm3915_vm3, %v3916_v22 }
 0x7b5   :  { %3587 = vmatpush3.bf16.msra.mxu0 %v1714_v49  ;;  %3593 = vmatpush3.bf16.msra.mxu1 %v1767_v50 }
 0x7b6   :  { %3598 = vmatprep.subr.mxu0 %v3916_v22  ;;  %2065 = vmatprep.subr.bf16.mxu1 %v3851_v58 }
 0x886   :  { %v1589_v33 = vpop.f32.mrb[20].mxu0  ;;  %v1677_v34 = vpop.f32.mrb[16].mxu1 }
 0x887   :  { %v1678_v36 = vadd.f32 %v1677_v34, %v1589_v33  ;;  %v3564_v37 = vpop.f32.mrb[21].mxu0  ;;  %v3584_v38 = vpop.f32.mrb[17].mxu1 }
 0x888   :  { %v1592_v39 = vpop.f32.mrb[22].mxu0  ;;  %v1680_v40 = vpop.f32.mrb[18].mxu1  ;;  %v3873_v37 = vld [vmem:[%s3189_s7] sm:$0xff]   ;;  %v3874_v38 = vld [vmem:[%s3189_s7 + $0x8] sm:$0xff]  }
 0x889   :  { %v1690_v41 = vadd.f32 %v3277_v35, %v1678_v36  ;;  %v3565_v43 = vpop.f32.mrb[23].mxu0  ;;  %v3585_v44 = vpop.f32.mrb[19].mxu1  ;;  %v2188_v35 = vld [vmem:[%s3188_s2 + $0x8] sm:$0xff]  ;;  %v2187_v36 = vld [vmem:[%s3188_s2] sm:$0xff]  ;;  %v3875_v39 = vld [vmem:[%s3189_s7 + $0x10] sm:$0xff]   ;;  %s3941_s2 = smov 124  }
 0x88a   :  { %v3876_v40 = vld [vmem:[%s3189_s7 + $0x18] sm:$0xff]   ;;  %v3310_v44 = vld [vmem:[%s4191_s11] ss:$0 sm:$0xff]  ;;  %s3196_s7 = sld [smem:[%s4258_s0 + %s3942_s3]]  }
 0x88b   :  { %v1692_v45 = vmul.f32 0.5, %v1690_v41  ;;  %3156 = vst.msk [vmem:[%s3197_s1] sm:$0x3] %vm3155_vm8, %v1690_v41  ;;  %s3195_s1 = sld [smem:[%s4258_s0 + %s3940_s28]]  }
 0x88d   :  { %v1693_v46 = vmul.f32 1.442695, %v1692_v45 }
 0x88f   :  { %3885 = vpow2.f32 %v1693_v46 }
 0x899   :  { %v3886_v51 = vpop.eup %3885 }
 0x89a   :  { %1696 = vrot.lane.b32.xlu1 %v3886_v51, %s3927_s6 }
 0x90c   :  { %v1697_v53 = vpop.permute.xlu1 %1696 }
 0x90d   :  { %v1699_v54 = vmul.f32 %v1697_v53, %v1691_v52 }
 0x90f   :  { %v1700_v55 = vadd.f32 %v1699_v54, %v1690_v41 }
 0x911   :  { %v1701_v56 = vpack.c.bf16 %v1700_v55, %v1700_v55 }
 0x913   :  { %3589 = vmatmul.mubr.msk.bf16.vlgmr.msra.gmra.mrb[24].mxu0 %vm1053_vm6, %v1701_v56  ;;  %3595 = vmatmul.mubr.msk.bf16.vlgmr.msra.gmra.mrb[20].mxu1 %vm1053_vm6, %v1701_v56 }
 0x914   :  { %3600 = vmatprep.mubr.msk.f32.mxu0 %vm3915_vm3, %v3916_v22  ;;  %2097 = vmatprep.mubr.bf16.mxu1 %v3912_v42  ;;  %v3863_v42 = vld [vmem:[%s3185_s16 + $0x44] ss:$8 sps:$4 sm:$0xff]  }
 0x915   :  { %2066 = vmatpush1.bf16.msra.mxu1 %v3849_v57 }
 0x916   :  { %2067 = vmatprep.subr.bf16.mxu1 %v3854_v59 }
 0x919   :  { %2068 = vmatpush1.bf16.msra.mxu1 %v3852_v60 }
 0x91a   :  { %2069 = vmatprep.subr.bf16.mxu1 %v3857_v61 }
 0x91d   :  { %2070 = vmatpush1.bf16.msra.mxu1 %v3855_v62 }
 0x91e   :  { %2071 = vmatprep.subr.bf16.mxu1 %v3860_v63 }
 0x921   :  { %2072 = vmatpush1.bf16.msra.mxu1 %v3858_v0 }
 0x922   :  { %2073 = vmatprep.subr.bf16.mxu1 %v3863_v42 }
 0x925   :  { %2074 = vmatpush1.bf16.msra.mxu1 %v3861_v1 }
 0x926   :  { %2075 = vmatprep.subr.bf16.mxu1 %v3866_v2 }
 0x929   :  { %2076 = vmatpush1.bf16.msra.mxu1 %v3864_v3 }
 0x92a   :  { %2077 = vmatprep.subr.bf16.mxu1 %v3869_v4 }
 0x92d   :  { %2078 = vmatpush1.bf16.msra.mxu1 %v3867_v5  ;;  %v3311_v5 = vld [vmem:[%s4191_s11 + $0x1] ss:$0 sm:$0xff] }
 0x92e   :  { %2079 = vmatprep.subr.bf16.mxu1 %v3872_v6 }
 0x931   :  { %2080 = vmatpush1.bf16.msra.mxu1 %v3870_v7  ;;  %v3312_v7 = vld [vmem:[%s4191_s11 + $0x2] ss:$0 sm:$0xff]  ;;  %s3944_s11 = smov 30  }
 0x932   :  { %3635 = vmatprep.subr.mxu1 %v3916_v22  ;;  %s3198_s16 = sld [smem:[%s4258_s0 + %s3944_s11]]  }
 0x9e6   :  { %v1750_v10 = vpop.f32.mrb[24].mxu0  ;;  %v1803_v11 = vpop.f32.mrb[20].mxu1 }
 0x9e7   :  { %v1804_v12 = vadd.f32 %v3282_v8, %v1803_v11  ;;  %v3590_v13 = vpop.f32.mrb[25].mxu0  ;;  %v3596_v14 = vpop.f32.mrb[21].mxu1  ;;  %v1751_v18 = vadd.f32 %v3278_v9, %v1750_v10 }
 0x9e8   :  { %v1753_v16 = vpop.f32.mrb[26].mxu0  ;;  %v1806_v17 = vpop.f32.mrb[22].mxu1 }
 0x9e9   :  { %v3591_v19 = vpop.f32.mrb[27].mxu0  ;;  %v3597_v20 = vpop.f32.mrb[23].mxu1  ;;  %3599 = vmatpush3.msk.msra.mxu0 %vm140_vm0, %v1804_v12 }
 0x9ea   :  { %3601 = vmatmul.mubr.msk.f32.vlgmr.msra.gmra.mrb[18].mxu0 %vm1809_vm9, %v1322_v15  ;;  %3603 = vmatprep.subr.mxu0 %v3916_v22  ;;  %v2459_v15 = vld [vmem:[%s3191_s17] sm:$0xff] }
 0x9eb   :  { %3604 = vmatpush3.msk.msra.mxu0 %vm140_vm0, %v1751_v18  ;;  %3605 = vmatprep.mubr.msk.f32.mxu0 %vm3915_vm3, %v3916_v22 }
 0x9ec   :  { %3608 = vmatprep.subr.mxu0 %v3916_v22 }
 0x9f2   :  { %3606 = vmatmul.mubr.msk.f32.vlgmr.msra.gmra.mrb[18].mxu0 %vm1809_vm9, %v1321_v21 }
 0x9f3   :  { %3610 = vmatprep.mubr.msk.f32.mxu0 %vm3915_vm3, %v3916_v22 }
 0xac5   :  { %v1958_v23 = vpop.f32.mrb[18].mxu0 }
 0xac6   :  { %v1968_v24 = vpack.c.bf16 %v1958_v23, %v1958_v23  ;;  %v3607_v25 = vpop.f32.mrb[19].mxu0 }
 0xac8   :  { %2098 = vmatmul.mubr.bf16.vlgmr.msra.gmra.mrb[24].mxu1 %v1968_v24 }
 0xac9   :  { %3637 = vmatprep.mubr.msk.f32.mxu1 %vm3915_vm3, %v3916_v22 }
 0xb9b   :  { %v2099_v26 = vpop.f32.mrb[24].mxu1 }
 0xb9c   :  { %2108 = vrot.lane.b32.xlu0 %v2099_v26, %s3909_s14  ;;  %v2101_v28 = vpop.f32.mrb[25].mxu1 }
 0xb9d   :  { %v2103_v29 = vpop.f32.mrb[26].mxu1  ;;  %3609 = vmatpush3.msk.msra.mxu0 %vm1282_vm7, %v2101_v28  ;;  %v3323_v28 = vld [vmem:[%s4221_s27] ss:$0 sm:$0xff] }
 0xb9e   :  { %v2104_v30 = vpop.f32.mrb[27].mxu1  ;;  %3611 = vmatmul.mubr.msk.f32.vlgmr.msra.gmra.mrb[28].mxu0 %vm133_vm1, %v2106_v27  ;;  %3613 = vmatprep.subr.mxu0 %v3916_v22 }
 0xb9f   :  { %3615 = vmatprep.mubr.msk.f32.mxu0 %vm3915_vm3, %v3916_v22 }
 0xc0e   :  { %v2109_v31 = vpop.permute.xlu0 %2108 }
 0xc71   :  { %v2183_v32 = vpop.f32.mrb[28].mxu0 }
 0xc72   :  { %v2184_v33 = vadd.f32 %v2183_v32, %v2109_v31  ;;  %v3612_v34 = vpop.f32.mrb[29].mxu0 }
 0xc74   :  { %3614 = vmatpush3.msk.msra.mxu0 %vm1282_vm7, %v2184_v33 }
 0xc75   :  { %3616 = vmatmul.mubr.msk.f32.vlgmr.msra.gmra.mrb[30].mxu0 %vm133_vm1, %v2188_v35  ;;  %3618 = vmatprep.subr.mxu0 %v3916_v22 }
 0xc76   :  { %3619 = vmatpush3.msk.msra.mxu0 %vm1282_vm7, %v2099_v26  ;;  %3620 = vmatprep.mubr.msk.f32.mxu0 %vm3915_vm3, %v3916_v22 }
 0xc77   :  { %3623 = vmatprep.subr.bf16.mxu0 %v3916_v22 }
 0xc79   :  { %3621 = vmatmul.mubr.msk.f32.vlgmr.msra.gmra.mrb[32].mxu0 %vm133_vm1, %v2187_v36 }
 0xc7a   :  { %3631 = vmatprep.mubr.msk.bf16.mxu0 %vm3915_vm3, %v3916_v22  ;;  %3624 = vmatpush3.bf16.msra.mxu0 %v3873_v37 }
 0xc7b   :  { %3625 = vmatprep.subr.bf16.mxu0 %v3916_v22 }
 0xc7e   :  { %3626 = vmatpush3.bf16.msra.mxu0 %v3874_v38 }
 0xc7f   :  { %3627 = vmatprep.subr.bf16.mxu0 %v3916_v22 }
 0xc82   :  { %3628 = vmatpush3.bf16.msra.mxu0 %v3875_v39 }
 0xc83   :  { %3629 = vmatprep.subr.bf16.mxu0 %v3916_v22 }
 0xc86   :  { %3630 = vmatpush3.bf16.msra.mxu0 %v3876_v40 }
 0xc87   :  { %3650 = vmatprep.subr.bf16.mxu0 %v3916_v22 }
 0xd48   :  { %v2261_v41 = vpop.f32.mrb[30].mxu0 }
 0xd49   :  { %v3617_v43 = vpop.f32.mrb[31].mxu0 }
 0xd4c   :  { %v2336_v45 = vpop.f32.mrb[32].mxu0 }
 0xd4d   :  { %v2337_v46 = vadd.f32 %v2336_v45, %v2261_v41  ;;  %v3622_v47 = vpop.f32.mrb[33].mxu0 }
 0xd4f   :  { %v2346_v48 = vadd.f32 %v3310_v44, %v2337_v46 }
 0xd51   :  { %v2347_v49 = vmax.f32 %v2346_v48, 0.0 }
 0xd53   :  { %v2348_v50 = vsel %vm845_vm5, %v2347_v49, 0.0 }
 0xd54   :  { %v2349_v51 = vrot.slane %v2348_v50, 4 }
 0xd56   :  { %v2350_v52 = vadd.f32 %v2349_v51, %v2348_v50 }
 0xd58   :  { %v2351_v53 = vrot.slane %v2350_v52, 2 }
 0xd5a   :  { %v2352_v54 = vadd.f32 %v2351_v53, %v2350_v52 }
 0xd5c   :  { %v2353_v55 = vrot.slane %v2352_v54, 1 }
 0xd5e   :  { %v2354_v56 = vadd.f32 %v2353_v55, %v2352_v54 }
 0xd60   :  { %v2355_v57 = vmul.f32 0.125, %v2354_v56 }
 0xd62   :  { %v2356_v58 = vsub.f32 %v2347_v49, %v2355_v57 }
 0xd64   :  { %v2357_v59 = vmul.f32 %v2356_v58, %v2356_v58 }
 0xd66   :  { %v2358_v60 = vsel %vm845_vm5, %v2357_v59, 0.0 }
 0xd67   :  { %v2359_v61 = vrot.slane %v2358_v60, 4 }
 0xd69   :  { %v2360_v62 = vadd.f32 %v2359_v61, %v2358_v60  ;;  %v3324_v61 = vld [vmem:[%s4221_s27 + $0x1] ss:$0 sm:$0xff] }
 0xd6b   :  { %v2361_v63 = vrot.slane %v2360_v62, 2 }
 0xd6d   :  { %v2362_v0 = vadd.f32 %v2361_v63, %v2360_v62 }
 0xd6f   :  { %v2363_v42 = vrot.slane %v2362_v0, 1 }
 0xd71   :  { %v2364_v1 = vadd.f32 %v2363_v42, %v2362_v0  ;;  %v3325_v0 = vld [vmem:[%s4221_s27 + $0x2] ss:$0 sm:$0xff] }
 0xd73   :  { %v2365_v2 = vmul.f32 0.125, %v2364_v1 }
 0xd75   :  { %v2366_v3 = vadd.f32 1e-05, %v2365_v2 }
 0xd77   :  { %3887 = vrsqrt.f32 %v2366_v3 }
 0xd81   :  { %v3888_v4 = vpop.eup %3887 }
 0xd82   :  { %v2368_v6 = vmul.f32 %v3888_v4, %v2356_v58 }
 0xd84   :  { %v2375_v8 = vmul.f32 %v3311_v5, %v2368_v6  ;;  %v2822_v5 = vld [vmem:[%s3195_s1] sm:$0xff] }
 0xd86   :  { %v2382_v9 = vadd.f32 %v3312_v7, %v2375_v8 }
 0xd88   :  { %v2383_v10 = vpack.c.bf16 %v2382_v9, %v2382_v9 }
 0xd8a   :  { %3632 = vmatmul.mubr.msk.bf16.vlgmr.msra.gmra.mrb[36].mxu0 %vm845_vm5, %v2383_v10 }
 0xd8b   :  { %3654 = vmatprep.mubr.msk.bf16.mxu0 %vm3915_vm3, %v3916_v22 }
 0xe5d   :  { %v2453_v11 = vpop.f32.mrb[36].mxu0 }
 0xe5e   :  { %2464 = vrot.lane.b32.xlu0 %v2453_v11, %s3910_s15  ;;  %2461 = vrot.lane.b32.xlu1 %v2453_v11, %s3909_s14  ;;  %v3633_v12 = vpop.f32.mrb[37].mxu0  ;;  %s3192_s15 = sld [smem:[%s4258_s0 + %s3937_s18]]   ;;  %s3938_s14 = smov 25  }
 0xe5f   :  { %v2456_v13 = vpop.f32.mrb[38].mxu0  ;;  %s3193_s23 = sld [smem:[%s4258_s0 + %s3938_s14]]  }
 0xe60   :  { %v3634_v14 = vpop.f32.mrb[39].mxu0 }
 0xe64   :  { %v2542_v17 = vld [vmem:[%s3192_s15 + $0x10] sm:$0xff]  ;;  %v2543_v23 = vld [vmem:[%s3192_s15 + $0x18] sm:$0xff]  ;;  %v2540_v24 = vld [vmem:[%s3192_s15] sm:$0xff] }
 0xe65   :  { %v2541_v25 = vld [vmem:[%s3192_s15 + $0x8] sm:$0xff]  ;;  %v3877_v26 = vld [vmem:[%s3193_s23] sm:$0xff]  }
 0xe66   :  { %3651 = vmatpush3.bf16.msra.mxu0 %v3877_v26  ;;  %v3878_v27 = vld [vmem:[%s3193_s23 + $0x8] sm:$0xff]  }
 0xe67   :  { %3652 = vmatprep.subr.bf16.mxu0 %v3916_v22  ;;  %v2924_v26 = vld [vmem:[%s3196_s7 + $0x28] sm:$0xff] }
 0xe6a   :  { %3653 = vmatpush3.bf16.msra.mxu0 %v3878_v27  ;;  %v2925_v27 = vld [vmem:[%s3196_s7 + $0x30] sm:$0xff] }
 0xed0   :  { %v2462_v16 = vpop.permute.xlu1 %2461  ;;  %v2465_v18 = vpop.permute.xlu0 %2464 }
 0xed1   :  { %3636 = vmatpush3.msra.mxu1 %v2462_v16  ;;  %v2823_v16 = vld [vmem:[%s3195_s1 + $0x8] sm:$0xff] }
 0xed2   :  { %3638 = vmatmul.mubr.msk.f32.vlgmr.msra.gmra.mrb[28].mxu1 %vm1053_vm6, %v2459_v15 }
 0xed3   :  { %3642 = vmatprep.mubr.msk.f32.mxu1 %vm1053_vm6, %v2542_v17  ;;  %v2923_v17 = vld [vmem:[%s3196_s7 + $0x20] sm:$0xff] }
 0xfa5   :  { %v2536_v19 = vpop.f32.mrb[28].mxu1 }
 0xfa6   :  { %v2537_v20 = vadd.f32 %v2536_v19, %v2465_v18  ;;  %v3639_v21 = vpop.f32.mrb[29].mxu1 }
 0xfa8   :  { %3640 = vmatprep.subr.mxu1 %v2537_v20 }
 0xfa9   :  { %3641 = vmatpush3.msra.mxu1 %v2537_v20 }
 0xfaa   :  { %3643 = vmatmul.mubr.msk.f32.vlgmr.msra.gmra.mrb[30].mxu1 %vm1053_vm6, %v2543_v23  ;;  %3645 = vmatprep.subr.mxu1 %v2453_v11 }
 0xfab   :  { %3646 = vmatpush3.msra.mxu1 %v2453_v11  ;;  %3647 = vmatprep.mubr.msk.f32.mxu1 %vm1053_vm6, %v2540_v24 }
 0xfb2   :  { %3648 = vmatmul.mubr.msk.f32.vlgmr.msra.gmra.mrb[30].mxu1 %vm1053_vm6, %v2541_v25 }
 0xfb3   :  { %3662 = vmatprep.mubr.msk.f32.mxu1 %vm616_vm4, %v2822_v5 }
0x1085   :  { %v3649_v29 = vpop.f32.mrb[30].mxu1 }
0x1086   :  { %v2713_v30 = vadd.f32 %v3649_v29, %v3323_v28  ;;  %v2697_v31 = vpop.f32.mrb[31].mxu1  ;;  %v2919_v29 = vld [vmem:[%s3196_s7] sm:$0xff] }
0x1087   :  { %v2712_v32 = vadd.f32 %v3323_v28, %v2697_v31  ;;  %v2926_v28 = vld [vmem:[%s3196_s7 + $0x38] sm:$0xff]  ;;  %v2921_v31 = vld [vmem:[%s3196_s7 + $0x10] sm:$0xff] }
0x1088   :  { %v2715_v33 = vmax.f32 %v2713_v30, 0.0  ;;  %v2920_v30 = vld [vmem:[%s3196_s7 + $0x8] sm:$0xff] }
0x1089   :  { %v2714_v34 = vmax.f32 %v2712_v32, 0.0  ;;  %v2922_v32 = vld [vmem:[%s3196_s7 + $0x18] sm:$0xff] }
0x108a   :  { %v2717_v35 = vsel %vm218_vm2, %v2715_v33, 0.0 }
0x108b   :  { %v2716_v22 = vsel %vm218_vm2, %v2714_v34, 0.0 }
0x108c   :  { %v2718_v36 = vadd.f32 %v2717_v35, %v2716_v22 }
0x108e   :  { %v2719_v37 = vrot.slane %v2718_v36, 4 }
0x1090   :  { %v2720_v38 = vadd.f32 %v2719_v37, %v2718_v36 }
0x1092   :  { %v2721_v39 = vrot.slane %v2720_v38, 2 }
0x1094   :  { %v2722_v40 = vadd.f32 %v2721_v39, %v2720_v38 }
0x1096   :  { %v2723_v41 = vrot.slane %v2722_v40, 1 }
0x1098   :  { %v2724_v43 = vadd.f32 %v2723_v41, %v2722_v40 }
0x109a   :  { %v2725_v44 = vmul.f32 0.0625, %v2724_v43 }
0x109c   :  { %v2726_v45 = vsub.f32 %v2714_v34, %v2725_v44  ;;  %v2727_v46 = vsub.f32 %v2715_v33, %v2725_v44 }
0x109e   :  { %v2728_v47 = vmul.f32 %v2726_v45, %v2726_v45  ;;  %v2729_v48 = vmul.f32 %v2727_v46, %v2727_v46 }
0x10a0   :  { %v2730_v49 = vsel %vm218_vm2, %v2728_v47, 0.0  ;;  %v2731_v50 = vsel %vm218_vm2, %v2729_v48, 0.0 }
0x10a1   :  { %v2732_v51 = vadd.f32 %v2731_v50, %v2730_v49 }
0x10a3   :  { %v2733_v52 = vrot.slane %v2732_v51, 4 }
0x10a5   :  { %v2734_v53 = vadd.f32 %v2733_v52, %v2732_v51 }
0x10a7   :  { %v2735_v54 = vrot.slane %v2734_v53, 2 }
0x10a9   :  { %v2736_v55 = vadd.f32 %v2735_v54, %v2734_v53 }
0x10ab   :  { %v2737_v56 = vrot.slane %v2736_v55, 1 }
0x10ad   :  { %v2738_v57 = vadd.f32 %v2737_v56, %v2736_v55 }
0x10af   :  { %v2739_v58 = vmul.f32 0.0625, %v2738_v57 }
0x10b1   :  { %v2740_v59 = vadd.f32 1e-05, %v2739_v58 }
0x10b3   :  { %3889 = vrsqrt.f32 %v2740_v59 }
0x10bd   :  { %v3890_v60 = vpop.eup %3889 }
0x10be   :  { %v2742_v62 = vmul.f32 %v3890_v60, %v2726_v45  ;;  %v2743_v63 = vmul.f32 %v3890_v60, %v2727_v46 }
0x10c0   :  { %v2750_v42 = vmul.f32 %v3324_v61, %v2742_v62  ;;  %v2751_v1 = vmul.f32 %v3324_v61, %v2743_v63 }
0x10c2   :  { %v2758_v2 = vadd.f32 %v3325_v0, %v2750_v42  ;;  %v2759_v3 = vadd.f32 %v3325_v0, %v2751_v1 }
0x10c4   :  { %v2761_v4 = vpack.c.bf16 %v2759_v3, %v2758_v2 }
0x10c6   :  { %3655 = vmatmul.mubr.msk.bf16.vlgmr.msra.gmra.mrb[40].mxu0 %vm218_vm2, %v2761_v4 }
0x10c7   :  { %3669 = vmatprep.mubr.msk.f32.mxu0 %vm616_vm4, %v2923_v17 }
0x1199   :  { %v2815_v6 = vpop.f32.mrb[40].mxu0 }
0x119a   :  { %2832 = vrot.lane.b32.xlu0 %v2815_v6, %s3941_s2  ;;  %v3656_v7 = vpop.f32.mrb[41].mxu0 }
0x119b   :  { %v2818_v8 = vpop.f32.mrb[42].mxu0 }
0x119c   :  { %v3806_v9 = vpack.i.bf16 %v2818_v8, %v2815_v6  ;;  %v3726_v10 = vpack.c.bf16 %v2818_v8, %v2815_v6  ;;  %v3657_v11 = vpop.f32.mrb[43].mxu0 }
0x119e   :  { %3807 = vrot.lane.b32.xlu1 %v3806_v9, %s3927_s6  ;;  %s3943_s6 = smov 26  }
0x119f   :  { %s3194_s10 = sld [smem:[%s4258_s0 + %s3943_s6]]  }
0x11a2   :  { %2834 = vrot.lane.b32.xlu1 %v2818_v8, %s3941_s2 }
0x11a5   :  { %v3339_v33 = vld [vmem:[%s3194_s10] ss:$0 sm:$0xff] }
0x120c   :  { %v2833_v20 = vpop.permute.xlu0 %2832 }
0x1210   :  { %v3808_v12 = vpop.permute.xlu1 %3807 }
0x1211   :  { %v3810_v13 = vunpack.i.h.bf16 %v3808_v12  ;;  %v3809_v14 = vunpack.i.l.bf16 %v3808_v12 }
0x1213   :  { %v3718_v15 = vpack.c.bf16 %v3810_v13, %v3809_v14 }
0x1214   :  { %v2835_v18 = vpop.permute.xlu1 %2834 }
0x1215   :  { %3719 = vmatprep.subr.bf16.mxu1 %v3718_v15 }
0x1216   :  { %3721 = vmatpush3.bf16.msra.mxu1 %v3718_v15 }
0x1219   :  { %3663 = vmatmul.mubr.msk.f32.vlgmr.msra.gmra.mrb[32].mxu1 %vm616_vm4, %v2823_v16 }
0x12ec   :  { %v3664_v19 = vpop.f32.mrb[32].mxu1 }
0x12ed   :  { %v2916_v21 = vadd.f32 %v3664_v19, %v2835_v18  ;;  %v2910_v23 = vpop.f32.mrb[33].mxu1 }
0x12ee   :  { %v2911_v24 = vadd.f32 %v2910_v23, %v2833_v20 }
0x12f0   :  { %v3722_v25 = vpack.c.bf16 %v2916_v21, %v2911_v24 }
0x12f2   :  { %3723 = vmatprep.subr.bf16.mxu0 %v3722_v25 }
0x12f3   :  { %3725 = vmatpush3.bf16.msra.mxu0 %v3722_v25 }
0x12f4   :  { %3727 = vmatprep.subr.bf16.mxu0 %v3726_v10 }
0x12f6   :  { %3670 = vmatmul.mubr.msk.f32.vlgmr.msra.gmra.mrb[34].mxu0 %vm616_vm4, %v2924_v26 }
0x12f7   :  { %3729 = vmatpush3.bf16.msra.mxu0 %v3726_v10  ;;  %3672 = vmatprep.mubr.msk.f32.mxu0 %vm616_vm4, %v2925_v27 }
0x12fa   :  { %3673 = vmatmul.mubr.msk.f32.gmra.mrb[44].mxu0 %vm616_vm4, %v2926_v28 }
0x12fb   :  { %3679 = vmatprep.mubr.msk.f32.mxu0 %vm616_vm4, %v2919_v29 }
0x12fe   :  { %3680 = vmatmul.mubr.msk.f32.vlgmr.msra.gmra.mrb[34].mxu0 %vm616_vm4, %v2920_v30 }
0x12ff   :  { %3682 = vmatprep.mubr.msk.f32.mxu0 %vm616_vm4, %v2921_v31 }
0x1302   :  { %3683 = vmatmul.mubr.msk.f32.gmra.mrb[44].mxu0 %vm616_vm4, %v2922_v32 }
0x13d1   :  { %v3681_v34 = vpop.f32.mrb[34].mxu0 }
0x13d2   :  { %v3128_v35 = vadd.f32 %v3681_v34, %v3339_v33  ;;  %v3102_v22 = vpop.f32.mrb[35].mxu0 }
0x13d3   :  { %v3127_v36 = vadd.f32 %v3339_v33, %v3102_v22 }
0x13d4   :  { %v3132_v37 = vsub.f32 0.0, %v3128_v35 }
0x13d5   :  { %v3131_v38 = vsub.f32 0.0, %v3127_v36  ;;  %v3684_v39 = vpop.f32.mrb[44].mxu0 }
0x13d6   :  { %v3137_v40 = vmul.f32 1.442695, %v3132_v37  ;;  %v3130_v41 = vadd.f32 %v3684_v39, %v3339_v33  ;;  %v3112_v43 = vpop.f32.mrb[45].mxu0 }
0x13d7   :  { %v3135_v44 = vmul.f32 1.442695, %v3131_v38  ;;  %v3129_v45 = vadd.f32 %v3339_v33, %v3112_v43 }
0x13d8   :  { %3891 = vpow2.f32 %v3137_v40  ;;  %v3134_v46 = vsub.f32 0.0, %v3130_v41 }
0x13d9   :  { %3893 = vpow2.f32 %v3135_v44  ;;  %v3133_v47 = vsub.f32 0.0, %v3129_v45 }
0x13da   :  { %v3141_v48 = vmul.f32 1.442695, %v3134_v46 }
0x13db   :  { %v3139_v49 = vmul.f32 1.442695, %v3133_v47 }
0x13dc   :  { %3895 = vpow2.f32 %v3141_v48 }
0x13dd   :  { %3897 = vpow2.f32 %v3139_v49 }
0x13e2   :  { %v3892_v50 = vpop.eup %3891 }
0x13e3   :  { %v3894_v51 = vpop.eup %3893  ;;  %v3144_v52 = vadd.f32 1.0, %v3892_v50 }
0x13e4   :  { %v3143_v53 = vadd.f32 1.0, %v3894_v51 }
0x13e5   :  { %3899 = vrcp.f32 %v3144_v52 }
0x13e6   :  { %v3896_v54 = vpop.eup %3895  ;;  %3901 = vrcp.f32 %v3143_v53 }
0x13e7   :  { %v3898_v55 = vpop.eup %3897  ;;  %v3146_v56 = vadd.f32 1.0, %v3896_v54 }
0x13e8   :  { %v3145_v57 = vadd.f32 1.0, %v3898_v55 }
0x13e9   :  { %3903 = vrcp.f32 %v3146_v56 }
0x13ea   :  { %3905 = vrcp.f32 %v3145_v57 }
0x13ef   :  { %v3900_v58 = vpop.eup %3899 }
0x13f0   :  { %v3902_v59 = vpop.eup %3901  ;;  %3158 = vst.msk [vmem:[%s3198_s16 + $0x8] sm:$0xff] %vm133_vm1, %v3900_v58 }
0x13f1   :  { %3157 = vst.msk [vmem:[%s3198_s16] sm:$0xff] %vm133_vm1, %v3902_v59 }
0x13f3   :  { %v3904_v60 = vpop.eup %3903 }
0x13f4   :  { %v3906_v61 = vpop.eup %3905  ;;  %3160 = vst.msk [vmem:[%s3198_s16 + $0x18] sm:$0xff] %vm133_vm1, %v3904_v60 }
0x13f5   :  { %3159 = vst.msk [vmem:[%s3198_s16 + $0x10] sm:$0xff] %vm133_vm1, %v3906_v61 }

</bundles_post_ra>
